<compile_context>
chip_gen: v7x
topology: tpu7x:2x2x1
jax: 0.10.0
libtpu: 0.0.40
codegen_flags: <defaults>
</compile_context>

<pallas_src>
import functools

import jax
import jax.numpy as jnp
from jax import lax
from jax.experimental import pallas as pl
from jax.experimental.pallas import tpu as pltpu

KH = KW = 3  # output_conv kernel size (3x3, padding=1, stride=1, out_channels=1)


def _laplace_glm_head_kernel(x_ref, wv_ref, scal_ref, mean_ref, var_ref, *, width):
    """GLM predictive (mean + diagonal variance) of a diag-Laplace 3x3 conv head.

    x_ref:    (bt, C, H*W)        features, flattened spatial on the lane axis
    wv_ref:   (2, KH*KW, C, H*W)  [0]=conv weight, [1]=posterior weight variance; one (C, H*W)
                                  slab per tap with the zero-padding halo mask folded in
    scal_ref: (2,) SMEM           [conv bias, posterior variance of the bias]
    mean_ref: (bt, H*W)           predictive mean (lane/sublane-dense)
    var_ref:  (bt, H*W)           predictive variance (diagonal_output=True)
    """
    bt, c, hw = x_ref.shape
    x = x_ref[...]                                   # (bt, C, HW): one dense load per grid step
    acc_m = jnp.zeros((bt, c, hw), jnp.float32)
    acc_v = jnp.zeros((bt, c, hw), jnp.float32)
    tap = 0
    for dy in range(KH):
        for dx in range(KW):
            # output pixel (y, x) reads input (y+dy-1, x+dx-1): a flat lane shift of s;
            # wrapped / out-of-image contributions are zeroed by the mask folded into wv.
            s = (dy - KH // 2) * width + (dx - KW // 2)
            xr = x if s == 0 else pltpu.roll(x, shift=(-s) % hw, axis=2)   # one XLU roll per tap
            w_m = wv_ref[0, tap]                     # (C, HW): loaded once per tap, not per b
            w_v = wv_ref[1, tap]
            acc_m = acc_m + xr * w_m[None, :, :]             # VPU FMA, broadcast over batch
            acc_v = acc_v + (xr * xr) * w_v[None, :, :]      # square computed in-kernel
            tap += 1
    # One cross-sublane reduce over C per output (XLU), then a dense (bt, HW) store per output.
    mean_ref[...] = jnp.sum(acc_m, axis=1) + scal_ref[0]
    var_ref[...] = jnp.sum(acc_v, axis=1) + scal_ref[1]


def _tensorcores_per_chip():
    """Best-effort TC-per-chip query; falls back to 1 (single-TC v5e/v6e behavior)."""
    try:
        info = pltpu.get_tpu_info()
        for name in ("num_cores", "num_tensorcores", "tensor_core_count", "cores_per_chip"):
            v = getattr(info, name, None)
            if isinstance(v, int) and v > 0:
                return v
    except Exception:
        pass
    return 1


def _physical_vmem_bytes():
    try:
        info = pltpu.get_tpu_info()
        v = int(getattr(info, "vmem_capacity_bytes", 0))
        if v > 0:
            return v
    except Exception:
        pass
    return 64 << 20  # conservative (v7x per-TC VMEM)


def _pick_bt(B, C, HW, two_tc):
    """Batch block size: spill-safe (2-4), divides B, sublane-friendly output block."""
    # Live vregs per batch element in the vectorized body: acc_m + acc_v + xr (f32).
    vregs_per_b = max(1, (3 * C * HW * 4 + 4095) // 4096)
    cap = max(1, min(4, 40 // vregs_per_b))
    # Output block (bt, HW): keep the sublane dim either equal to the full batch or 8-aligned.
    cands = [d for d in range(1, B + 1) if B % d == 0 and (d == B or d % 8 == 0)]
    if two_tc and B >= 2:
        halves = [d for d in cands if (B // d) >= 2]     # give both v7x TCs work when possible
        if halves:
            cands = halves
    fit = [d for d in cands if d <= cap]
    return max(fit) if fit else min(cands)


def _head_call(x, wv, scal, *, B, C, HW, KK, W, bt, vmem_limit, single_buffer_wv):
    grid = (B // bt,)
    kernel = functools.partial(_laplace_glm_head_kernel, width=W)
    wv_spec_kwargs = {"pipeline_mode": pl.Buffered(1)} if single_buffer_wv else {}
    return pl.pallas_call(
        kernel,
        out_shape=(jax.ShapeDtypeStruct((B, HW), jnp.float32),
                   jax.ShapeDtypeStruct((B, HW), jnp.float32)),
        grid_spec=pltpu.PrefetchScalarGridSpec(
            num_scalar_prefetch=0,
            grid=grid,
            in_specs=[
                pl.BlockSpec((bt, C, HW), lambda i: (i, 0, 0)),
                # Constant across the grid: fetched once; single-buffered when supported.
                pl.BlockSpec((2, KK, C, HW), lambda i: (0, 0, 0, 0), **wv_spec_kwargs),
                pl.BlockSpec(memory_space=pltpu.MemorySpace.SMEM),
            ],
            out_specs=[
                pl.BlockSpec((bt, HW), lambda i: (i, 0)),
                pl.BlockSpec((bt, HW), lambda i: (i, 0)),
            ],
        ),
        compiler_params=pltpu.CompilerParams(
            dimension_semantics=("parallel",),
            vmem_limit_bytes=vmem_limit,
        ),
    )(x, wv, scal)


def laplace_glm_head(feats_nchw, conv_w_oihw, conv_b, post_var_w_oihw, post_var_b):
    """Pallas-backed GLM predictive of the Laplace-approximated output conv.

    feats_nchw:      (B, C, H, W)  float32 features (backbone NCHW output -- no transpose needed)
    conv_w_oihw:     (1, C, 3, 3)  output_conv weight
    conv_b:          (1,)          output_conv bias
    post_var_w_oihw: (1, C, 3, 3)  diagonal posterior variance (weight part)
    post_var_b:      scalar        diagonal posterior variance (bias part)
    Returns (mean, var), each (B, 1, H, W).
    """
    B, C, H, W = feats_nchw.shape
    HW = H * W  # lane axis; typical image sizes give H*W a multiple of 128 (256 here)
    KK = KH * KW

    x = feats_nchw.reshape(B, C, HW).astype(jnp.float32)   # free reshape; no pad/square/transpose

    # Fold the conv's zero padding into per-tap halo masks and pre-broadcast the (tiny, constant)
    # weights to (C, HW) slabs, so the kernel is pure roll + FMA (no in-kernel iota or broadcast).
    yy = jnp.repeat(jnp.arange(H), W)                       # flat index -> y
    xx = jnp.tile(jnp.arange(W), H)                         # flat index -> x
    masks = []
    for dy in range(KH):
        for dx in range(KW):
            oy, ox = dy - KH // 2, dx - KW // 2
            valid = (yy + oy >= 0) & (yy + oy < H) & (xx + ox >= 0) & (xx + ox < W)
            masks.append(valid.astype(jnp.float32))
    mask = jnp.stack(masks)                                               # (KK, HW)
    w_taps = jnp.transpose(conv_w_oihw[0], (1, 2, 0)).reshape(KK, C)      # [tap, c]
    v_taps = jnp.transpose(post_var_w_oihw[0], (1, 2, 0)).reshape(KK, C)
    wv = jnp.stack([w_taps[:, :, None] * mask[:, None, :],
                    v_taps[:, :, None] * mask[:, None, :]]).astype(jnp.float32)  # (2, KK, C, HW)

    scal = jnp.stack([conv_b[0], jnp.asarray(post_var_b)]).astype(jnp.float32)   # (2,) SMEM

    # Batch blocking: single grid step for small batches on single-TC chips (v5e/v6e); only
    # force >= 2 steps when the chip has 2 TensorCores (v7x) and the batch allows.
    bt = _pick_bt(B, C, HW, two_tc=_tensorcores_per_chip() >= 2)

    # VMEM budget from the actual (dense) buffers, clamped to the real device with headroom.
    x_block = bt * C * HW * 4
    out_block = bt * HW * 4
    wv_bytes = int(wv.size) * 4
    bufs = 2 * x_block + 2 * 2 * out_block + 2 * wv_bytes        # conservative: wv double-buffered
    phys = _physical_vmem_bytes()
    vmem_limit = int(min(max(16 << 20, phys - (16 << 20)),
                         max(16 << 20, bufs + (4 << 20))))

    kwargs = dict(B=B, C=C, HW=HW, KK=KK, W=W, bt=bt, vmem_limit=vmem_limit)
    try:
        mean, var = _head_call(x, wv, scal, single_buffer_wv=True, **kwargs)
    except Exception:
        # Fall back to default double-buffering if this build rejects pipeline_mode=Buffered(1).
        mean, var = _head_call(x, wv, scal, single_buffer_wv=False, **kwargs)

    return mean.reshape(B, 1, H, W), var.reshape(B, 1, H, W)


# --------------------------- plain-JAX glue -----------------------------------

def _conv_nchw(x, w, b):
    out = lax.conv_general_dilated(
        x, w, window_strides=(1, 1), padding="SAME",
        dimension_numbers=("NCHW", "OIHW", "NCHW"))
    return out + b.reshape(1, -1, 1, 1)


def feature_extractor(params, x, t, y):
    # TODO(synk): stand-in for `diff_model` with output_conv replaced by nn.Identity(); the real
    # diffusion backbone is external to this module, so a small synthetic conv + timestep/class
    # embedding + SiLU is used here (plain-JAX glue).
    h = _conv_nchw(x, params["fe_w"], params["fe_b"])              # (B, Cfeat, H, W)
    temb = jnp.sin(t[:, None] * params["t_freq"][None, :])         # (B, Cfeat)
    yemb = params["y_table"][y]                                    # (B, Cfeat)
    h = h + (temb + yemb)[:, :, None, None]
    return jax.nn.silu(h)


class LaplaceApproxModelPallas:
    """JAX/Pallas counterpart of LaplaceApproxModel.forward (GLM predictive head)."""

    def __init__(self, key, in_ch, feat_ch, img_size, num_classes):
        k = jax.random.split(key, 6)
        self.img_size = img_size
        self.params = dict(
            fe_w=0.1 * jax.random.normal(k[0], (feat_ch, in_ch, 3, 3), jnp.float32),
            fe_b=jnp.zeros((feat_ch,), jnp.float32),
            t_freq=0.01 * jax.random.normal(k[1], (feat_ch,), jnp.float32),
            y_table=0.1 * jax.random.normal(k[2], (num_classes, feat_ch), jnp.float32),
        )
        # output_conv: Conv2d(feat_ch, 1, 3, padding=1)
        self.conv_out_w = 0.1 * jax.random.normal(k[3], (1, feat_ch, 3, 3), jnp.float32)
        self.conv_out_b = jnp.zeros((1,), jnp.float32)
        # TODO(synk): the fit() Hessian-accumulation loop is training-time; here the diagonal EF
        # Hessian is a deterministic synthetic positive vector.
        n_params = self.conv_out_w.size + 1
        h_diag = jnp.abs(jax.random.normal(k[4], (n_params,), jnp.float32)) * 5.0
        # posterior precision = H_factor * H + prior_precision, with sigma_noise=1, temperature=1
        # (H_factor=1) and prior_precision=1.
        posterior_var = 1.0 / (h_diag + 1.0)
        # parameters_to_vector order: weight (row-major) then bias.
        self.post_var_w = posterior_var[:self.conv_out_w.size].reshape(self.conv_out_w.shape)
        self.post_var_b = posterior_var[-1]

    def forward(self, x, t, y):
        feats = feature_extractor(self.params, x, t, y)
        mean, var = laplace_glm_head(feats, self.conv_out_w, self.conv_out_b,
                                     self.post_var_w, self.post_var_b)
        return mean, var, feats


if __name__ == "__main__":
    key = jax.random.PRNGKey(0)
    B, Cin, img = 2, 3, 16
    Cfeat, ncls = 8, 10

    kx, kt, ky, kmodel = jax.random.split(key, 4)
    x = jax.random.normal(kx, (B, Cin, img, img), jnp.float32)
    t = jax.random.uniform(kt, (B,), jnp.float32) * 1000.0
    y = jax.random.randint(ky, (B,), 0, ncls)

    model = LaplaceApproxModelPallas(kmodel, Cin, Cfeat, img, ncls)
    mean, var, feats = model.forward(x, t, y)
    jax.block_until_ready((mean, var))

    # Pure-JAX reference for the Pallas head.
    ref_mean = _conv_nchw(feats, model.conv_out_w, model.conv_out_b).reshape(B, 1, img, img)
    ref_var = _conv_nchw(feats * feats, model.post_var_w,
                         jnp.array([model.post_var_b])).reshape(B, 1, img, img)
    assert mean.shape == (B, 1, img, img) and var.shape == (B, 1, img, img)
    assert jnp.allclose(mean, ref_mean, atol=1e-4, rtol=1e-4)
    assert jnp.allclose(var, ref_var, atol=1e-4, rtol=1e-4)
    assert bool(jnp.all(var > 0.0))

    print("KERNEL_OK")
</pallas_src>

<mosaic_0001>
module attributes {stable_mosaic.version = 11 : i64} {
  func.func @_laplace_glm_head_kernel(%arg0: i32, %arg1: memref<2x8x256xf32, #tpu.memory_space<vmem>>, %arg2: memref<2x9x8x256xf32, #tpu.memory_space<vmem>>, %arg3: memref<2xf32, #tpu.memory_space<smem>>, %arg4: memref<2x256xf32, #tpu.memory_space<vmem>>, %arg5: memref<2x256xf32, #tpu.memory_space<vmem>>) attributes {dimension_semantics = [#tpu.dimension_semantics<parallel>], iteration_bounds = array<i64: 1>, scalar_prefetch = 0 : i64, scratch_operands = 0 : i64, tpu.core_type = #tpu.core_type<tc>, window_params = [{transform_indices = @transform_0, window_bounds = array<i64: 2, 8, 256>}, {pipeline_mode = #tpu.pipeline_mode<synchronous>, transform_indices = @transform_1, window_bounds = array<i64: 2, 9, 8, 256>}, {transform_indices = @transform_2, window_bounds = array<i64: 2>}, {transform_indices = @transform_3, window_bounds = array<i64: 2, 256>}, {transform_indices = @transform_4, window_bounds = array<i64: 2, 256>}]} {
    %c0 = arith.constant 0 : index
    %c0_0 = arith.constant 0 : index
    %c0_1 = arith.constant 0 : index
    %0 = vector.load %arg1[%c0, %c0_0, %c0_1] : memref<2x8x256xf32, #tpu.memory_space<vmem>>, vector<2x8x256xf32>
    %cst = arith.constant 0.000000e+00 : f32
    %1 = vector.broadcast %cst : f32 to vector<2x8x256xf32>
    %cst_2 = arith.constant 0.000000e+00 : f32
    %2 = vector.broadcast %cst_2 : f32 to vector<2x8x256xf32>
    %c17_i32 = arith.constant 17 : i32
    %3 = tpu.dynamic_rotate %0 by %c17_i32 dim 2 : vector<2x8x256xf32>, i32 -> vector<2x8x256xf32>
    %c0_3 = arith.constant 0 : index
    %c0_4 = arith.constant 0 : index
    %c0_5 = arith.constant 0 : index
    %c0_6 = arith.constant 0 : index
    %4 = vector.load %arg2[%c0_3, %c0_4, %c0_5, %c0_6] : memref<2x9x8x256xf32, #tpu.memory_space<vmem>>, vector<1x1x8x256xf32>
    %5 = vector.shape_cast %4 : vector<1x1x8x256xf32> to vector<8x256xf32>
    %c1 = arith.constant 1 : index
    %c0_7 = arith.constant 0 : index
    %c0_8 = arith.constant 0 : index
    %c0_9 = arith.constant 0 : index
    %6 = vector.load %arg2[%c1, %c0_7, %c0_8, %c0_9] : memref<2x9x8x256xf32, #tpu.memory_space<vmem>>, vector<1x1x8x256xf32>
    %7 = vector.shape_cast %6 : vector<1x1x8x256xf32> to vector<8x256xf32>
    %8 = vector.shape_cast %5 : vector<8x256xf32> to vector<1x8x256xf32>
    %9 = vector.broadcast %8 : vector<1x8x256xf32> to vector<2x8x256xf32>
    %10 = arith.mulf %3, %9 : vector<2x8x256xf32>
    %11 = arith.addf %1, %10 : vector<2x8x256xf32>
    %12 = arith.mulf %3, %3 : vector<2x8x256xf32>
    %13 = vector.shape_cast %7 : vector<8x256xf32> to vector<1x8x256xf32>
    %14 = vector.broadcast %13 : vector<1x8x256xf32> to vector<2x8x256xf32>
    %15 = arith.mulf %12, %14 : vector<2x8x256xf32>
    %16 = arith.addf %2, %15 : vector<2x8x256xf32>
    %c16_i32 = arith.constant 16 : i32
    %17 = tpu.dynamic_rotate %0 by %c16_i32 dim 2 : vector<2x8x256xf32>, i32 -> vector<2x8x256xf32>
    %c0_10 = arith.constant 0 : index
    %c1_11 = arith.constant 1 : index
    %c0_12 = arith.constant 0 : index
    %c0_13 = arith.constant 0 : index
    %18 = vector.load %arg2[%c0_10, %c1_11, %c0_12, %c0_13] : memref<2x9x8x256xf32, #tpu.memory_space<vmem>>, vector<1x1x8x256xf32>
    %19 = vector.shape_cast %18 : vector<1x1x8x256xf32> to vector<8x256xf32>
    %c1_14 = arith.constant 1 : index
    %c1_15 = arith.constant 1 : index
    %c0_16 = arith.constant 0 : index
    %c0_17 = arith.constant 0 : index
    %20 = vector.load %arg2[%c1_14, %c1_15, %c0_16, %c0_17] : memref<2x9x8x256xf32, #tpu.memory_space<vmem>>, vector<1x1x8x256xf32>
    %21 = vector.shape_cast %20 : vector<1x1x8x256xf32> to vector<8x256xf32>
    %22 = vector.shape_cast %19 : vector<8x256xf32> to vector<1x8x256xf32>
    %23 = vector.broadcast %22 : vector<1x8x256xf32> to vector<2x8x256xf32>
    %24 = arith.mulf %17, %23 : vector<2x8x256xf32>
    %25 = arith.addf %11, %24 : vector<2x8x256xf32>
    %26 = arith.mulf %17, %17 : vector<2x8x256xf32>
    %27 = vector.shape_cast %21 : vector<8x256xf32> to vector<1x8x256xf32>
    %28 = vector.broadcast %27 : vector<1x8x256xf32> to vector<2x8x256xf32>
    %29 = arith.mulf %26, %28 : vector<2x8x256xf32>
    %30 = arith.addf %16, %29 : vector<2x8x256xf32>
    %c15_i32 = arith.constant 15 : i32
    %31 = tpu.dynamic_rotate %0 by %c15_i32 dim 2 : vector<2x8x256xf32>, i32 -> vector<2x8x256xf32>
    %c0_18 = arith.constant 0 : index
    %c2 = arith.constant 2 : index
    %c0_19 = arith.constant 0 : index
    %c0_20 = arith.constant 0 : index
    %32 = vector.load %arg2[%c0_18, %c2, %c0_19, %c0_20] : memref<2x9x8x256xf32, #tpu.memory_space<vmem>>, vector<1x1x8x256xf32>
    %33 = vector.shape_cast %32 : vector<1x1x8x256xf32> to vector<8x256xf32>
    %c1_21 = arith.constant 1 : index
    %c2_22 = arith.constant 2 : index
    %c0_23 = arith.constant 0 : index
    %c0_24 = arith.constant 0 : index
    %34 = vector.load %arg2[%c1_21, %c2_22, %c0_23, %c0_24] : memref<2x9x8x256xf32, #tpu.memory_space<vmem>>, vector<1x1x8x256xf32>
    %35 = vector.shape_cast %34 : vector<1x1x8x256xf32> to vector<8x256xf32>
    %36 = vector.shape_cast %33 : vector<8x256xf32> to vector<1x8x256xf32>
    %37 = vector.broadcast %36 : vector<1x8x256xf32> to vector<2x8x256xf32>
    %38 = arith.mulf %31, %37 : vector<2x8x256xf32>
    %39 = arith.addf %25, %38 : vector<2x8x256xf32>
    %40 = arith.mulf %31, %31 : vector<2x8x256xf32>
    %41 = vector.shape_cast %35 : vector<8x256xf32> to vector<1x8x256xf32>
    %42 = vector.broadcast %41 : vector<1x8x256xf32> to vector<2x8x256xf32>
    %43 = arith.mulf %40, %42 : vector<2x8x256xf32>
    %44 = arith.addf %30, %43 : vector<2x8x256xf32>
    %c1_i32 = arith.constant 1 : i32
    %45 = tpu.dynamic_rotate %0 by %c1_i32 dim 2 : vector<2x8x256xf32>, i32 -> vector<2x8x256xf32>
    %c0_25 = arith.constant 0 : index
    %c3 = arith.constant 3 : index
    %c0_26 = arith.constant 0 : index
    %c0_27 = arith.constant 0 : index
    %46 = vector.load %arg2[%c0_25, %c3, %c0_26, %c0_27] : memref<2x9x8x256xf32, #tpu.memory_space<vmem>>, vector<1x1x8x256xf32>
    %47 = vector.shape_cast %46 : vector<1x1x8x256xf32> to vector<8x256xf32>
    %c1_28 = arith.constant 1 : index
    %c3_29 = arith.constant 3 : index
    %c0_30 = arith.constant 0 : index
    %c0_31 = arith.constant 0 : index
    %48 = vector.load %arg2[%c1_28, %c3_29, %c0_30, %c0_31] : memref<2x9x8x256xf32, #tpu.memory_space<vmem>>, vector<1x1x8x256xf32>
    %49 = vector.shape_cast %48 : vector<1x1x8x256xf32> to vector<8x256xf32>
    %50 = vector.shape_cast %47 : vector<8x256xf32> to vector<1x8x256xf32>
    %51 = vector.broadcast %50 : vector<1x8x256xf32> to vector<2x8x256xf32>
    %52 = arith.mulf %45, %51 : vector<2x8x256xf32>
    %53 = arith.addf %39, %52 : vector<2x8x256xf32>
    %54 = arith.mulf %45, %45 : vector<2x8x256xf32>
    %55 = vector.shape_cast %49 : vector<8x256xf32> to vector<1x8x256xf32>
    %56 = vector.broadcast %55 : vector<1x8x256xf32> to vector<2x8x256xf32>
    %57 = arith.mulf %54, %56 : vector<2x8x256xf32>
    %58 = arith.addf %44, %57 : vector<2x8x256xf32>
    %c0_32 = arith.constant 0 : index
    %c4 = arith.constant 4 : index
    %c0_33 = arith.constant 0 : index
    %c0_34 = arith.constant 0 : index
    %59 = vector.load %arg2[%c0_32, %c4, %c0_33, %c0_34] : memref<2x9x8x256xf32, #tpu.memory_space<vmem>>, vector<1x1x8x256xf32>
    %60 = vector.shape_cast %59 : vector<1x1x8x256xf32> to vector<8x256xf32>
    %c1_35 = arith.constant 1 : index
    %c4_36 = arith.constant 4 : index
    %c0_37 = arith.constant 0 : index
    %c0_38 = arith.constant 0 : index
    %61 = vector.load %arg2[%c1_35, %c4_36, %c0_37, %c0_38] : memref<2x9x8x256xf32, #tpu.memory_space<vmem>>, vector<1x1x8x256xf32>
    %62 = vector.shape_cast %61 : vector<1x1x8x256xf32> to vector<8x256xf32>
    %63 = vector.shape_cast %60 : vector<8x256xf32> to vector<1x8x256xf32>
    %64 = vector.broadcast %63 : vector<1x8x256xf32> to vector<2x8x256xf32>
    %65 = arith.mulf %0, %64 : vector<2x8x256xf32>
    %66 = arith.addf %53, %65 : vector<2x8x256xf32>
    %67 = arith.mulf %0, %0 : vector<2x8x256xf32>
    %68 = vector.shape_cast %62 : vector<8x256xf32> to vector<1x8x256xf32>
    %69 = vector.broadcast %68 : vector<1x8x256xf32> to vector<2x8x256xf32>
    %70 = arith.mulf %67, %69 : vector<2x8x256xf32>
    %71 = arith.addf %58, %70 : vector<2x8x256xf32>
    %c255_i32 = arith.constant 255 : i32
    %72 = tpu.dynamic_rotate %0 by %c255_i32 dim 2 : vector<2x8x256xf32>, i32 -> vector<2x8x256xf32>
    %c0_39 = arith.constant 0 : index
    %c5 = arith.constant 5 : index
    %c0_40 = arith.constant 0 : index
    %c0_41 = arith.constant 0 : index
    %73 = vector.load %arg2[%c0_39, %c5, %c0_40, %c0_41] : memref<2x9x8x256xf32, #tpu.memory_space<vmem>>, vector<1x1x8x256xf32>
    %74 = vector.shape_cast %73 : vector<1x1x8x256xf32> to vector<8x256xf32>
    %c1_42 = arith.constant 1 : index
    %c5_43 = arith.constant 5 : index
    %c0_44 = arith.constant 0 : index
    %c0_45 = arith.constant 0 : index
    %75 = vector.load %arg2[%c1_42, %c5_43, %c0_44, %c0_45] : memref<2x9x8x256xf32, #tpu.memory_space<vmem>>, vector<1x1x8x256xf32>
    %76 = vector.shape_cast %75 : vector<1x1x8x256xf32> to vector<8x256xf32>
    %77 = vector.shape_cast %74 : vector<8x256xf32> to vector<1x8x256xf32>
    %78 = vector.broadcast %77 : vector<1x8x256xf32> to vector<2x8x256xf32>
    %79 = arith.mulf %72, %78 : vector<2x8x256xf32>
    %80 = arith.addf %66, %79 : vector<2x8x256xf32>
    %81 = arith.mulf %72, %72 : vector<2x8x256xf32>
    %82 = vector.shape_cast %76 : vector<8x256xf32> to vector<1x8x256xf32>
    %83 = vector.broadcast %82 : vector<1x8x256xf32> to vector<2x8x256xf32>
    %84 = arith.mulf %81, %83 : vector<2x8x256xf32>
    %85 = arith.addf %71, %84 : vector<2x8x256xf32>
    %c241_i32 = arith.constant 241 : i32
    %86 = tpu.dynamic_rotate %0 by %c241_i32 dim 2 : vector<2x8x256xf32>, i32 -> vector<2x8x256xf32>
    %c0_46 = arith.constant 0 : index
    %c6 = arith.constant 6 : index
    %c0_47 = arith.constant 0 : index
    %c0_48 = arith.constant 0 : index
    %87 = vector.load %arg2[%c0_46, %c6, %c0_47, %c0_48] : memref<2x9x8x256xf32, #tpu.memory_space<vmem>>, vector<1x1x8x256xf32>
    %88 = vector.shape_cast %87 : vector<1x1x8x256xf32> to vector<8x256xf32>
    %c1_49 = arith.constant 1 : index
    %c6_50 = arith.constant 6 : index
    %c0_51 = arith.constant 0 : index
    %c0_52 = arith.constant 0 : index
    %89 = vector.load %arg2[%c1_49, %c6_50, %c0_51, %c0_52] : memref<2x9x8x256xf32, #tpu.memory_space<vmem>>, vector<1x1x8x256xf32>
    %90 = vector.shape_cast %89 : vector<1x1x8x256xf32> to vector<8x256xf32>
    %91 = vector.shape_cast %88 : vector<8x256xf32> to vector<1x8x256xf32>
    %92 = vector.broadcast %91 : vector<1x8x256xf32> to vector<2x8x256xf32>
    %93 = arith.mulf %86, %92 : vector<2x8x256xf32>
    %94 = arith.addf %80, %93 : vector<2x8x256xf32>
    %95 = arith.mulf %86, %86 : vector<2x8x256xf32>
    %96 = vector.shape_cast %90 : vector<8x256xf32> to vector<1x8x256xf32>
    %97 = vector.broadcast %96 : vector<1x8x256xf32> to vector<2x8x256xf32>
    %98 = arith.mulf %95, %97 : vector<2x8x256xf32>
    %99 = arith.addf %85, %98 : vector<2x8x256xf32>
    %c240_i32 = arith.constant 240 : i32
    %100 = tpu.dynamic_rotate %0 by %c240_i32 dim 2 : vector<2x8x256xf32>, i32 -> vector<2x8x256xf32>
    %c0_53 = arith.constant 0 : index
    %c7 = arith.constant 7 : index
    %c0_54 = arith.constant 0 : index
    %c0_55 = arith.constant 0 : index
    %101 = vector.load %arg2[%c0_53, %c7, %c0_54, %c0_55] : memref<2x9x8x256xf32, #tpu.memory_space<vmem>>, vector<1x1x8x256xf32>
    %102 = vector.shape_cast %101 : vector<1x1x8x256xf32> to vector<8x256xf32>
    %c1_56 = arith.constant 1 : index
    %c7_57 = arith.constant 7 : index
    %c0_58 = arith.constant 0 : index
    %c0_59 = arith.constant 0 : index
    %103 = vector.load %arg2[%c1_56, %c7_57, %c0_58, %c0_59] : memref<2x9x8x256xf32, #tpu.memory_space<vmem>>, vector<1x1x8x256xf32>
    %104 = vector.shape_cast %103 : vector<1x1x8x256xf32> to vector<8x256xf32>
    %105 = vector.shape_cast %102 : vector<8x256xf32> to vector<1x8x256xf32>
    %106 = vector.broadcast %105 : vector<1x8x256xf32> to vector<2x8x256xf32>
    %107 = arith.mulf %100, %106 : vector<2x8x256xf32>
    %108 = arith.addf %94, %107 : vector<2x8x256xf32>
    %109 = arith.mulf %100, %100 : vector<2x8x256xf32>
    %110 = vector.shape_cast %104 : vector<8x256xf32> to vector<1x8x256xf32>
    %111 = vector.broadcast %110 : vector<1x8x256xf32> to vector<2x8x256xf32>
    %112 = arith.mulf %109, %111 : vector<2x8x256xf32>
    %113 = arith.addf %99, %112 : vector<2x8x256xf32>
    %c239_i32 = arith.constant 239 : i32
    %114 = tpu.dynamic_rotate %0 by %c239_i32 dim 2 : vector<2x8x256xf32>, i32 -> vector<2x8x256xf32>
    %c0_60 = arith.constant 0 : index
    %c8 = arith.constant 8 : index
    %c0_61 = arith.constant 0 : index
    %c0_62 = arith.constant 0 : index
    %115 = vector.load %arg2[%c0_60, %c8, %c0_61, %c0_62] : memref<2x9x8x256xf32, #tpu.memory_space<vmem>>, vector<1x1x8x256xf32>
    %116 = vector.shape_cast %115 : vector<1x1x8x256xf32> to vector<8x256xf32>
    %c1_63 = arith.constant 1 : index
    %c8_64 = arith.constant 8 : index
    %c0_65 = arith.constant 0 : index
    %c0_66 = arith.constant 0 : index
    %117 = vector.load %arg2[%c1_63, %c8_64, %c0_65, %c0_66] : memref<2x9x8x256xf32, #tpu.memory_space<vmem>>, vector<1x1x8x256xf32>
    %118 = vector.shape_cast %117 : vector<1x1x8x256xf32> to vector<8x256xf32>
    %119 = vector.shape_cast %116 : vector<8x256xf32> to vector<1x8x256xf32>
    %120 = vector.broadcast %119 : vector<1x8x256xf32> to vector<2x8x256xf32>
    %121 = arith.mulf %114, %120 : vector<2x8x256xf32>
    %122 = arith.addf %108, %121 : vector<2x8x256xf32>
    %123 = arith.mulf %114, %114 : vector<2x8x256xf32>
    %124 = vector.shape_cast %118 : vector<8x256xf32> to vector<1x8x256xf32>
    %125 = vector.broadcast %124 : vector<1x8x256xf32> to vector<2x8x256xf32>
    %126 = arith.mulf %123, %125 : vector<2x8x256xf32>
    %127 = arith.addf %113, %126 : vector<2x8x256xf32>
    %cst_67 = arith.constant dense<0.000000e+00> : vector<2x256xf32>
    %128 = vector.multi_reduction <add>, %122, %cst_67 [1] : vector<2x8x256xf32> to vector<2x256xf32>
    %c0_68 = arith.constant 0 : index
    %129 = memref.load %arg3[%c0_68] : memref<2xf32, #tpu.memory_space<smem>>
    %130 = vector.broadcast %129 : f32 to vector<2x256xf32>
    %131 = arith.addf %128, %130 : vector<2x256xf32>
    %c0_69 = arith.constant 0 : index
    %c0_70 = arith.constant 0 : index
    %132 = vector.load %arg4[%c0_69, %c0_70] : memref<2x256xf32, #tpu.memory_space<vmem>>, vector<2x256xf32>
    tpu.vector_store %arg4[%c0_69, %c0_70], %131 {strides = array<i32>} : memref<2x256xf32, #tpu.memory_space<vmem>>, vector<2x256xf32>,
    %cst_71 = arith.constant dense<0.000000e+00> : vector<2x256xf32>
    %133 = vector.multi_reduction <add>, %127, %cst_71 [1] : vector<2x8x256xf32> to vector<2x256xf32>
    %c1_72 = arith.constant 1 : index
    %134 = memref.load %arg3[%c1_72] : memref<2xf32, #tpu.memory_space<smem>>
    %135 = vector.broadcast %134 : f32 to vector<2x256xf32>
    %136 = arith.addf %133, %135 : vector<2x256xf32>
    %c0_73 = arith.constant 0 : index
    %c0_74 = arith.constant 0 : index
    %137 = vector.load %arg5[%c0_73, %c0_74] : memref<2x256xf32, #tpu.memory_space<vmem>>, vector<2x256xf32>
    tpu.vector_store %arg5[%c0_73, %c0_74], %136 {strides = array<i32>} : memref<2x256xf32, #tpu.memory_space<vmem>>, vector<2x256xf32>,
    return
  }
  func.func @transform_0(%arg0: i32) -> (i32, i32, i32) {
    %c0_i32 = arith.constant 0 : i32
    %c0_i32_0 = arith.constant 0 : i32
    %c0_i32_1 = arith.constant 0 : i32
    return %arg0, %c0_i32, %c0_i32_0 : i32, i32, i32
  }
  func.func @transform_1(%arg0: i32) -> (i32, i32, i32, i32) {
    %c0_i32 = arith.constant 0 : i32
    %c0_i32_0 = arith.constant 0 : i32
    %c0_i32_1 = arith.constant 0 : i32
    %c0_i32_2 = arith.constant 0 : i32
    %c0_i32_3 = arith.constant 0 : i32
    return %c0_i32, %c0_i32_0, %c0_i32_1, %c0_i32_2 : i32, i32, i32, i32
  }
  func.func @transform_2(%arg0: i32) -> i32 {
    %c0_i32 = arith.constant 0 : i32
    %c0_i32_0 = arith.constant 0 : i32
    return %c0_i32 : i32
  }
  func.func @transform_3(%arg0: i32) -> (i32, i32) {
    %c0_i32 = arith.constant 0 : i32
    %c0_i32_0 = arith.constant 0 : i32
    return %arg0, %c0_i32 : i32, i32
  }
  func.func @transform_4(%arg0: i32) -> (i32, i32) {
    %c0_i32 = arith.constant 0 : i32
    %c0_i32_0 = arith.constant 0 : i32
    return %arg0, %c0_i32 : i32, i32
  }
}

module attributes {stable_mosaic.version = 11 : i64} {
  func.func @_laplace_glm_head_kernel(%arg0: i32, %arg1: memref<2x8x256xf32, #tpu.memory_space<vmem>>, %arg2: memref<2x9x8x256xf32, #tpu.memory_space<vmem>>, %arg3: memref<2xf32, #tpu.memory_space<smem>>, %arg4: memref<2x256xf32, #tpu.memory_space<vmem>>, %arg5: memref<2x256xf32, #tpu.memory_space<vmem>>) attributes {dimension_semantics = [#tpu.dimension_semantics<parallel>], iteration_bounds = array<i64: 1>, scalar_prefetch = 0 : i64, scratch_operands = 0 : i64, tpu.core_type = #tpu.core_type<tc>, window_params = [{transform_indices = @transform_0, window_bounds = array<i64: 2, 8, 256>}, {pipeline_mode = #tpu.pipeline_mode<synchronous>, transform_indices = @transform_1, window_bounds = array<i64: 2, 9, 8, 256>}, {transform_indices = @transform_2, window_bounds = array<i64: 2>}, {transform_indices = @transform_3, window_bounds = array<i64: 2, 256>}, {transform_indices = @transform_4, window_bounds = array<i64: 2, 256>}]} {
    %c0 = arith.constant 0 : index
    %c0_0 = arith.constant 0 : index
    %c0_1 = arith.constant 0 : index
    %0 = vector.load %arg1[%c0, %c0_0, %c0_1] : memref<2x8x256xf32, #tpu.memory_space<vmem>>, vector<2x8x256xf32>
    %cst = arith.constant 0.000000e+00 : f32
    %1 = vector.broadcast %cst : f32 to vector<2x8x256xf32>
    %cst_2 = arith.constant 0.000000e+00 : f32
    %2 = vector.broadcast %cst_2 : f32 to vector<2x8x256xf32>
    %c17_i32 = arith.constant 17 : i32
    %3 = tpu.dynamic_rotate %0 by %c17_i32 dim 2 : vector<2x8x256xf32>, i32 -> vector<2x8x256xf32>
    %c0_3 = arith.constant 0 : index
    %c0_4 = arith.constant 0 : index
    %c0_5 = arith.constant 0 : index
    %c0_6 = arith.constant 0 : index
    %4 = vector.load %arg2[%c0_3, %c0_4, %c0_5, %c0_6] : memref<2x9x8x256xf32, #tpu.memory_space<vmem>>, vector<1x1x8x256xf32>
    %5 = vector.shape_cast %4 : vector<1x1x8x256xf32> to vector<8x256xf32>
    %c1 = arith.constant 1 : index
    %c0_7 = arith.constant 0 : index
    %c0_8 = arith.constant 0 : index
    %c0_9 = arith.constant 0 : index
    %6 = vector.load %arg2[%c1, %c0_7, %c0_8, %c0_9] : memref<2x9x8x256xf32, #tpu.memory_space<vmem>>, vector<1x1x8x256xf32>
    %7 = vector.shape_cast %6 : vector<1x1x8x256xf32> to vector<8x256xf32>
    %8 = vector.shape_cast %5 : vector<8x256xf32> to vector<1x8x256xf32>
    %9 = vector.broadcast %8 : vector<1x8x256xf32> to vector<2x8x256xf32>
    %10 = arith.mulf %3, %9 : vector<2x8x256xf32>
    %11 = arith.addf %1, %10 : vector<2x8x256xf32>
    %12 = arith.mulf %3, %3 : vector<2x8x256xf32>
    %13 = vector.shape_cast %7 : vector<8x256xf32> to vector<1x8x256xf32>
    %14 = vector.broadcast %13 : vector<1x8x256xf32> to vector<2x8x256xf32>
    %15 = arith.mulf %12, %14 : vector<2x8x256xf32>
    %16 = arith.addf %2, %15 : vector<2x8x256xf32>
    %c16_i32 = arith.constant 16 : i32
    %17 = tpu.dynamic_rotate %0 by %c16_i32 dim 2 : vector<2x8x256xf32>, i32 -> vector<2x8x256xf32>
    %c0_10 = arith.constant 0 : index
    %c1_11 = arith.constant 1 : index
    %c0_12 = arith.constant 0 : index
    %c0_13 = arith.constant 0 : index
    %18 = vector.load %arg2[%c0_10, %c1_11, %c0_12, %c0_13] : memref<2x9x8x256xf32, #tpu.memory_space<vmem>>, vector<1x1x8x256xf32>
    %19 = vector.shape_cast %18 : vector<1x1x8x256xf32> to vector<8x256xf32>
    %c1_14 = arith.constant 1 : index
    %c1_15 = arith.constant 1 : index
    %c0_16 = arith.constant 0 : index
    %c0_17 = arith.constant 0 : index
    %20 = vector.load %arg2[%c1_14, %c1_15, %c0_16, %c0_17] : memref<2x9x8x256xf32, #tpu.memory_space<vmem>>, vector<1x1x8x256xf32>
    %21 = vector.shape_cast %20 : vector<1x1x8x256xf32> to vector<8x256xf32>
    %22 = vector.shape_cast %19 : vector<8x256xf32> to vector<1x8x256xf32>
    %23 = vector.broadcast %22 : vector<1x8x256xf32> to vector<2x8x256xf32>
    %24 = arith.mulf %17, %23 : vector<2x8x256xf32>
    %25 = arith.addf %11, %24 : vector<2x8x256xf32>
    %26 = arith.mulf %17, %17 : vector<2x8x256xf32>
    %27 = vector.shape_cast %21 : vector<8x256xf32> to vector<1x8x256xf32>
    %28 = vector.broadcast %27 : vector<1x8x256xf32> to vector<2x8x256xf32>
    %29 = arith.mulf %26, %28 : vector<2x8x256xf32>
    %30 = arith.addf %16, %29 : vector<2x8x256xf32>
    %c15_i32 = arith.constant 15 : i32
    %31 = tpu.dynamic_rotate %0 by %c15_i32 dim 2 : vector<2x8x256xf32>, i32 -> vector<2x8x256xf32>
    %c0_18 = arith.constant 0 : index
    %c2 = arith.constant 2 : index
    %c0_19 = arith.constant 0 : index
    %c0_20 = arith.constant 0 : index
    %32 = vector.load %arg2[%c0_18, %c2, %c0_19, %c0_20] : memref<2x9x8x256xf32, #tpu.memory_space<vmem>>, vector<1x1x8x256xf32>
    %33 = vector.shape_cast %32 : vector<1x1x8x256xf32> to vector<8x256xf32>
    %c1_21 = arith.constant 1 : index
    %c2_22 = arith.constant 2 : index
    %c0_23 = arith.constant 0 : index
    %c0_24 = arith.constant 0 : index
    %34 = vector.load %arg2[%c1_21, %c2_22, %c0_23, %c0_24] : memref<2x9x8x256xf32, #tpu.memory_space<vmem>>, vector<1x1x8x256xf32>
    %35 = vector.shape_cast %34 : vector<1x1x8x256xf32> to vector<8x256xf32>
    %36 = vector.shape_cast %33 : vector<8x256xf32> to vector<1x8x256xf32>
    %37 = vector.broadcast %36 : vector<1x8x256xf32> to vector<2x8x256xf32>
    %38 = arith.mulf %31, %37 : vector<2x8x256xf32>
    %39 = arith.addf %25, %38 : vector<2x8x256xf32>
    %40 = arith.mulf %31, %31 : vector<2x8x256xf32>
    %41 = vector.shape_cast %35 : vector<8x256xf32> to vector<1x8x256xf32>
    %42 = vector.broadcast %41 : vector<1x8x256xf32> to vector<2x8x256xf32>
    %43 = arith.mulf %40, %42 : vector<2x8x256xf32>
    %44 = arith.addf %30, %43 : vector<2x8x256xf32>
    %c1_i32 = arith.constant 1 : i32
    %45 = tpu.dynamic_rotate %0 by %c1_i32 dim 2 : vector<2x8x256xf32>, i32 -> vector<2x8x256xf32>
    %c0_25 = arith.constant 0 : index
    %c3 = arith.constant 3 : index
    %c0_26 = arith.constant 0 : index
    %c0_27 = arith.constant 0 : index
    %46 = vector.load %arg2[%c0_25, %c3, %c0_26, %c0_27] : memref<2x9x8x256xf32, #tpu.memory_space<vmem>>, vector<1x1x8x256xf32>
    %47 = vector.shape_cast %46 : vector<1x1x8x256xf32> to vector<8x256xf32>
    %c1_28 = arith.constant 1 : index
    %c3_29 = arith.constant 3 : index
    %c0_30 = arith.constant 0 : index
    %c0_31 = arith.constant 0 : index
    %48 = vector.load %arg2[%c1_28, %c3_29, %c0_30, %c0_31] : memref<2x9x8x256xf32, #tpu.memory_space<vmem>>, vector<1x1x8x256xf32>
    %49 = vector.shape_cast %48 : vector<1x1x8x256xf32> to vector<8x256xf32>
    %50 = vector.shape_cast %47 : vector<8x256xf32> to vector<1x8x256xf32>
    %51 = vector.broadcast %50 : vector<1x8x256xf32> to vector<2x8x256xf32>
    %52 = arith.mulf %45, %51 : vector<2x8x256xf32>
    %53 = arith.addf %39, %52 : vector<2x8x256xf32>
    %54 = arith.mulf %45, %45 : vector<2x8x256xf32>
    %55 = vector.shape_cast %49 : vector<8x256xf32> to vector<1x8x256xf32>
    %56 = vector.broadcast %55 : vector<1x8x256xf32> to vector<2x8x256xf32>
    %57 = arith.mulf %54, %56 : vector<2x8x256xf32>
    %58 = arith.addf %44, %57 : vector<2x8x256xf32>
    %c0_32 = arith.constant 0 : index
    %c4 = arith.constant 4 : index
    %c0_33 = arith.constant 0 : index
    %c0_34 = arith.constant 0 : index
    %59 = vector.load %arg2[%c0_32, %c4, %c0_33, %c0_34] : memref<2x9x8x256xf32, #tpu.memory_space<vmem>>, vector<1x1x8x256xf32>
    %60 = vector.shape_cast %59 : vector<1x1x8x256xf32> to vector<8x256xf32>
    %c1_35 = arith.constant 1 : index
    %c4_36 = arith.constant 4 : index
    %c0_37 = arith.constant 0 : index
    %c0_38 = arith.constant 0 : index
    %61 = vector.load %arg2[%c1_35, %c4_36, %c0_37, %c0_38] : memref<2x9x8x256xf32, #tpu.memory_space<vmem>>, vector<1x1x8x256xf32>
    %62 = vector.shape_cast %61 : vector<1x1x8x256xf32> to vector<8x256xf32>
    %63 = vector.shape_cast %60 : vector<8x256xf32> to vector<1x8x256xf32>
    %64 = vector.broadcast %63 : vector<1x8x256xf32> to vector<2x8x256xf32>
    %65 = arith.mulf %0, %64 : vector<2x8x256xf32>
    %66 = arith.addf %53, %65 : vector<2x8x256xf32>
    %67 = arith.mulf %0, %0 : vector<2x8x256xf32>
    %68 = vector.shape_cast %62 : vector<8x256xf32> to vector<1x8x256xf32>
    %69 = vector.broadcast %68 : vector<1x8x256xf32> to vector<2x8x256xf32>
    %70 = arith.mulf %67, %69 : vector<2x8x256xf32>
    %71 = arith.addf %58, %70 : vector<2x8x256xf32>
    %c255_i32 = arith.constant 255 : i32
    %72 = tpu.dynamic_rotate %0 by %c255_i32 dim 2 : vector<2x8x256xf32>, i32 -> vector<2x8x256xf32>
    %c0_39 = arith.constant 0 : index
    %c5 = arith.constant 5 : index
    %c0_40 = arith.constant 0 : index
    %c0_41 = arith.constant 0 : index
    %73 = vector.load %arg2[%c0_39, %c5, %c0_40, %c0_41] : memref<2x9x8x256xf32, #tpu.memory_space<vmem>>, vector<1x1x8x256xf32>
    %74 = vector.shape_cast %73 : vector<1x1x8x256xf32> to vector<8x256xf32>
    %c1_42 = arith.constant 1 : index
    %c5_43 = arith.constant 5 : index
    %c0_44 = arith.constant 0 : index
    %c0_45 = arith.constant 0 : index
    %75 = vector.load %arg2[%c1_42, %c5_43, %c0_44, %c0_45] : memref<2x9x8x256xf32, #tpu.memory_space<vmem>>, vector<1x1x8x256xf32>
    %76 = vector.shape_cast %75 : vector<1x1x8x256xf32> to vector<8x256xf32>
    %77 = vector.shape_cast %74 : vector<8x256xf32> to vector<1x8x256xf32>
    %78 = vector.broadcast %77 : vector<1x8x256xf32> to vector<2x8x256xf32>
    %79 = arith.mulf %72, %78 : vector<2x8x256xf32>
    %80 = arith.addf %66, %79 : vector<2x8x256xf32>
    %81 = arith.mulf %72, %72 : vector<2x8x256xf32>
    %82 = vector.shape_cast %76 : vector<8x256xf32> to vector<1x8x256xf32>
    %83 = vector.broadcast %82 : vector<1x8x256xf32> to vector<2x8x256xf32>
    %84 = arith.mulf %81, %83 : vector<2x8x256xf32>
    %85 = arith.addf %71, %84 : vector<2x8x256xf32>
    %c241_i32 = arith.constant 241 : i32
    %86 = tpu.dynamic_rotate %0 by %c241_i32 dim 2 : vector<2x8x256xf32>, i32 -> vector<2x8x256xf32>
    %c0_46 = arith.constant 0 : index
    %c6 = arith.constant 6 : index
    %c0_47 = arith.constant 0 : index
    %c0_48 = arith.constant 0 : index
    %87 = vector.load %arg2[%c0_46, %c6, %c0_47, %c0_48] : memref<2x9x8x256xf32, #tpu.memory_space<vmem>>, vector<1x1x8x256xf32>
    %88 = vector.shape_cast %87 : vector<1x1x8x256xf32> to vector<8x256xf32>
    %c1_49 = arith.constant 1 : index
    %c6_50 = arith.constant 6 : index
    %c0_51 = arith.constant 0 : index
    %c0_52 = arith.constant 0 : index
    %89 = vector.load %arg2[%c1_49, %c6_50, %c0_51, %c0_52] : memref<2x9x8x256xf32, #tpu.memory_space<vmem>>, vector<1x1x8x256xf32>
    %90 = vector.shape_cast %89 : vector<1x1x8x256xf32> to vector<8x256xf32>
    %91 = vector.shape_cast %88 : vector<8x256xf32> to vector<1x8x256xf32>
    %92 = vector.broadcast %91 : vector<1x8x256xf32> to vector<2x8x256xf32>
    %93 = arith.mulf %86, %92 : vector<2x8x256xf32>
    %94 = arith.addf %80, %93 : vector<2x8x256xf32>
    %95 = arith.mulf %86, %86 : vector<2x8x256xf32>
    %96 = vector.shape_cast %90 : vector<8x256xf32> to vector<1x8x256xf32>
    %97 = vector.broadcast %96 : vector<1x8x256xf32> to vector<2x8x256xf32>
    %98 = arith.mulf %95, %97 : vector<2x8x256xf32>
    %99 = arith.addf %85, %98 : vector<2x8x256xf32>
    %c240_i32 = arith.constant 240 : i32
    %100 = tpu.dynamic_rotate %0 by %c240_i32 dim 2 : vector<2x8x256xf32>, i32 -> vector<2x8x256xf32>
    %c0_53 = arith.constant 0 : index
    %c7 = arith.constant 7 : index
    %c0_54 = arith.constant 0 : index
    %c0_55 = arith.constant 0 : index
    %101 = vector.load %arg2[%c0_53, %c7, %c0_54, %c0_55] : memref<2x9x8x256xf32, #tpu.memory_space<vmem>>, vector<1x1x8x256xf32>
    %102 = vector.shape_cast %101 : vector<1x1x8x256xf32> to vector<8x256xf32>
    %c1_56 = arith.constant 1 : index
    %c7_57 = arith.constant 7 : index
    %c0_58 = arith.constant 0 : index
    %c0_59 = arith.constant 0 : index
    %103 = vector.load %arg2[%c1_56, %c7_57, %c0_58, %c0_59] : memref<2x9x8x256xf32, #tpu.memory_space<vmem>>, vector<1x1x8x256xf32>
    %104 = vector.shape_cast %103 : vector<1x1x8x256xf32> to vector<8x256xf32>
    %105 = vector.shape_cast %102 : vector<8x256xf32> to vector<1x8x256xf32>
    %106 = vector.broadcast %105 : vector<1x8x256xf32> to vector<2x8x256xf32>
    %107 = arith.mulf %100, %106 : vector<2x8x256xf32>
    %108 = arith.addf %94, %107 : vector<2x8x256xf32>
    %109 = arith.mulf %100, %100 : vector<2x8x256xf32>
    %110 = vector.shape_cast %104 : vector<8x256xf32> to vector<1x8x256xf32>
    %111 = vector.broadcast %110 : vector<1x8x256xf32> to vector<2x8x256xf32>
    %112 = arith.mulf %109, %111 : vector<2x8x256xf32>
    %113 = arith.addf %99, %112 : vector<2x8x256xf32>
    %c239_i32 = arith.constant 239 : i32
    %114 = tpu.dynamic_rotate %0 by %c239_i32 dim 2 : vector<2x8x256xf32>, i32 -> vector<2x8x256xf32>
    %c0_60 = arith.constant 0 : index
    %c8 = arith.constant 8 : index
    %c0_61 = arith.constant 0 : index
    %c0_62 = arith.constant 0 : index
    %115 = vector.load %arg2[%c0_60, %c8, %c0_61, %c0_62] : memref<2x9x8x256xf32, #tpu.memory_space<vmem>>, vector<1x1x8x256xf32>
    %116 = vector.shape_cast %115 : vector<1x1x8x256xf32> to vector<8x256xf32>
    %c1_63 = arith.constant 1 : index
    %c8_64 = arith.constant 8 : index
    %c0_65 = arith.constant 0 : index
    %c0_66 = arith.constant 0 : index
    %117 = vector.load %arg2[%c1_63, %c8_64, %c0_65, %c0_66] : memref<2x9x8x256xf32, #tpu.memory_space<vmem>>, vector<1x1x8x256xf32>
    %118 = vector.shape_cast %117 : vector<1x1x8x256xf32> to vector<8x256xf32>
    %119 = vector.shape_cast %116 : vector<8x256xf32> to vector<1x8x256xf32>
    %120 = vector.broadcast %119 : vector<1x8x256xf32> to vector<2x8x256xf32>
    %121 = arith.mulf %114, %120 : vector<2x8x256xf32>
    %122 = arith.addf %108, %121 : vector<2x8x256xf32>
    %123 = arith.mulf %114, %114 : vector<2x8x256xf32>
    %124 = vector.shape_cast %118 : vector<8x256xf32> to vector<1x8x256xf32>
    %125 = vector.broadcast %124 : vector<1x8x256xf32> to vector<2x8x256xf32>
    %126 = arith.mulf %123, %125 : vector<2x8x256xf32>
    %127 = arith.addf %113, %126 : vector<2x8x256xf32>
    %cst_67 = arith.constant dense<0.000000e+00> : vector<2x256xf32>
    %128 = vector.multi_reduction <add>, %122, %cst_67 [1] : vector<2x8x256xf32> to vector<2x256xf32>
    %c0_68 = arith.constant 0 : index
    %129 = memref.load %arg3[%c0_68] : memref<2xf32, #tpu.memory_space<smem>>
    %130 = vector.broadcast %129 : f32 to vector<2x256xf32>
    %131 = arith.addf %128, %130 : vector<2x256xf32>
    %c0_69 = arith.constant 0 : index
    %c0_70 = arith.constant 0 : index
    %132 = vector.load %arg4[%c0_69, %c0_70] : memref<2x256xf32, #tpu.memory_space<vmem>>, vector<2x256xf32>
    tpu.vector_store %arg4[%c0_69, %c0_70], %131 {strides = array<i32>} : memref<2x256xf32, #tpu.memory_space<vmem>>, vector<2x256xf32>,
    %cst_71 = arith.constant dense<0.000000e+00> : vector<2x256xf32>
    %133 = vector.multi_reduction <add>, %127, %cst_71 [1] : vector<2x8x256xf32> to vector<2x256xf32>
    %c1_72 = arith.constant 1 : index
    %134 = memref.load %arg3[%c1_72] : memref<2xf32, #tpu.memory_space<smem>>
    %135 = vector.broadcast %134 : f32 to vector<2x256xf32>
    %136 = arith.addf %133, %135 : vector<2x256xf32>
    %c0_73 = arith.constant 0 : index
    %c0_74 = arith.constant 0 : index
    %137 = vector.load %arg5[%c0_73, %c0_74] : memref<2x256xf32, #tpu.memory_space<vmem>>, vector<2x256xf32>
    tpu.vector_store %arg5[%c0_73, %c0_74], %136 {strides = array<i32>} : memref<2x256xf32, #tpu.memory_space<vmem>>, vector<2x256xf32>,
    return
  }
  func.func @transform_0(%arg0: i32) -> (i32, i32, i32) {
    %c0_i32 = arith.constant 0 : i32
    %c0_i32_0 = arith.constant 0 : i32
    %c0_i32_1 = arith.constant 0 : i32
    return %arg0, %c0_i32, %c0_i32_0 : i32, i32, i32
  }
  func.func @transform_1(%arg0: i32) -> (i32, i32, i32, i32) {
    %c0_i32 = arith.constant 0 : i32
    %c0_i32_0 = arith.constant 0 : i32
    %c0_i32_1 = arith.constant 0 : i32
    %c0_i32_2 = arith.constant 0 : i32
    %c0_i32_3 = arith.constant 0 : i32
    return %c0_i32, %c0_i32_0, %c0_i32_1, %c0_i32_2 : i32, i32, i32, i32
  }
  func.func @transform_2(%arg0: i32) -> i32 {
    %c0_i32 = arith.constant 0 : i32
    %c0_i32_0 = arith.constant 0 : i32
    return %c0_i32 : i32
  }
  func.func @transform_3(%arg0: i32) -> (i32, i32) {
    %c0_i32 = arith.constant 0 : i32
    %c0_i32_0 = arith.constant 0 : i32
    return %arg0, %c0_i32 : i32, i32
  }
  func.func @transform_4(%arg0: i32) -> (i32, i32) {
    %c0_i32 = arith.constant 0 : i32
    %c0_i32_0 = arith.constant 0 : i32
    return %arg0, %c0_i32 : i32, i32
  }
}

</mosaic_0001>

<bundles_post_ra>
// kernel: tpu_custom_call.1
= control target key start
LH: loop header
LB: loop body
LE: loop exit
PB: predicated region body
PF: predicated region fallthrough
CT: control target
= control target key end

     0   :  { %10 = vsyncpa [#allocation3], 0  ;;  %s970_s0 = inlined_call_operand.hbm [shape: f32[2,8,256], index: 0, kind: input, shape index: {}]   ;;  %s971_s1 = inlined_call_operand.hbm [shape: f32[2,9,8,256], index: 1, kind: input, shape index: {}]   ;;  %s972_s2 = inlined_call_operand.vmem [shape: f32[2], index: 2, kind: input, shape index: {}]   ;;  %s973_s3 = inlined_call_operand.hbm [shape: f32[2,256], index: 3, kind: output, shape index: {0}]   ;;  %s974_s4 = inlined_call_operand.hbm [shape: f32[2,256], index: 4, kind: output, shape index: {1}]  }
   0x1   :  { %11 = vsyncpa [#allocation7], 0 }
   0x2   :  { %12 = vsyncpa [#allocation5], 0 }
   0x3   :  { %13 = vsyncpa [#allocation4], 0 }
   0x4   :  { %14 = vsyncpa [#allocation11], 0  ;;  %s683_s15 = smov [#allocation2]   ;;  %s573_s19 = scalar_lea.hbm %s970_s0, 512 }
   0x5   :  { %s20_s16 = sshll.u32 %s683_s15, 4  ;;  %p574_p0 = scmp.ne.s32.totalorder %s970_s0, %s573_s19  ;;  %s21_s16 = int_to_ptr.vmem [resolvable:$true] %s20_s16 }
   0x6   :  { %p577_p1 = scmp.lt.u32.totalorder %s573_s19, %s970_s0 }
   0x8   :  { %p579_p2 = pnand %p577_p1, %p574_p0 }
   0xa   :  { %582 = shalt.err (!%p579_p2)
}
   0xb   :  { %s583_s24 = scalar_lea.vmem %s21_s16, 512  ;;  %p588_p4 = scmp.lt.s32.totalorder %s21_s16, %s21_s16 }
   0xc   :  { %p584_p3 = scmp.ne.s32.totalorder %s21_s16, %s583_s24  ;;  %p589_p5 = scmp.lt.s32.totalorder %s583_s24, %s583_s24 }
   0xe   :  { %p590_p6 = por %p589_p5, %p588_p4 }
  0x10   :  { %p591_p7 = pnand %p590_p6, %p584_p3 }
  0x12   :  { %594 = shalt.err (!%p591_p7)
}
  0x13   :  { %s684_s25 = smov 256   ;;  %s685_s26 = smov 16  }
  0x14   :  { %26 = dma.hbm_to_vmem [thread:$0]  %s970_s0, 512, %s21_s16, [#allocation3], %s684_s25, %s684_s25, %s685_s26  }
  0x15   :  { %s686_s29 = smov [#allocation6]   ;;  %s45_s7 = sshll.u32 %s972_s2, 4  ;;  %s46_s7 = int_to_ptr.vmem [resolvable:$true] %s45_s7 }
  0x16   :  { %s32_s30 = sshll.u32 %s686_s29, 4  ;;  %s595_s10 = scalar_lea.hbm %s971_s1, 4608  ;;  %s33_s30 = int_to_ptr.vmem [resolvable:$true] %s32_s30 }
  0x17   :  { %p596_p8 = scmp.ne.s32.totalorder %s971_s1, %s595_s10  ;;  %p599_p9 = scmp.lt.u32.totalorder %s595_s10, %s971_s1 }
  0x19   :  { %p601_p10 = pnand %p599_p9, %p596_p8 }
  0x1b   :  { %604 = shalt.err (!%p601_p10)
}
  0x1c   :  { %s605_s0 = scalar_lea.vmem %s33_s30, 4608  ;;  %p610_p12 = scmp.lt.s32.totalorder %s33_s30, %s33_s30 }
  0x1d   :  { %p606_p11 = scmp.ne.s32.totalorder %s33_s30, %s605_s0  ;;  %p611_p13 = scmp.lt.s32.totalorder %s605_s0, %s605_s0 }
  0x1f   :  { %p612_p0 = por %p611_p13, %p610_p12 }
  0x21   :  { %p613_p1 = pnand %p612_p0, %p606_p11 }
  0x23   :  { %616 = shalt.err (!%p613_p1)
}
  0x24   :  { %38 = dma.hbm_to_vmem [thread:$0]  %s971_s1, 4608, %s33_s30, [#allocation7], %s684_s25, %s684_s25, %s685_s26  }
  0x25   :  { %s617_s16 = scalar_lea.vmem %s46_s7, 16  ;;  %p622_p3 = scmp.lt.s32.totalorder %s46_s7, %s46_s7 }
  0x26   :  { %p618_p2 = scmp.ne.s32.totalorder %s46_s7, %s617_s16  ;;  %p623_p4 = scmp.lt.s32.totalorder %s617_s16, %s617_s16 }
  0x28   :  { %p624_p5 = por %p623_p4, %p622_p3 }
  0x2a   :  { %p625_p6 = pnand %p624_p5, %p618_p2 }
  0x2c   :  { %628 = shalt.err (!%p625_p6)
}
  0x2d   :  { %s687_s17 = smov [#allocation8]  }
  0x2e   :  { %48 = dma.vmem_to_smem %s46_s7, 16, %s687_s17, [#allocation5]  }
  0x2f   :  { %673 = dma.done.wait [#allocation3], 512  }
  0x30   :  { %674 = vsyncadd [#allocation3], 4294966784 }
  0x31   :  { %675 = dma.done.wait [#allocation7], 4608  }
  0x32   :  { %676 = vsyncadd [#allocation7], 4294962688 }
  0x33   :  { %677 = dma.done.wait [#allocation5], 16  }
  0x34   :  { %678 = vsyncadd [#allocation5], 4294967280 }
  0x35   :  { %58 = sfence }
  0x36   :  { %v752_v0 = vld [vmem:[#allocation2 + $0x10] sm:$0xff]  ;;  %s688_s1 = smov 17   ;;  %v757_v1 = vld [vmem:[#allocation2 + $0x18] sm:$0xff]  ;;  %v762_v2 = vld [vmem:[#allocation2 + $0x8] sm:$0xff]  ;;  %s689_s18 = smov 15   ;;  %v71_v6 = vlaneseq  ;;  %vm457_vm8 = vcmask 1041409  }
  0x37   :  { %105 = vrot.lane.b32.xlu1 %v752_v0, %s685_s26  ;;  %65 = vrot.lane.b32.xlu0 %v752_v0, %s688_s1  ;;  %v764_v3 = vld [vmem:[#allocation2] sm:$0xff]  ;;  %s690_s19 = smov 1   ;;  %s691_s20 = smov 127   ;;  %v236_v12 = vmul.f32 %v752_v0, %v752_v0  ;;  %v222_v14 = vld [vmem:[#allocation6 + $0x48] sm:$0xff]  ;;  %v224_v15 = vld [vmem:[#allocation6 + $0xd0] sm:$0xff]  ;;  %v237_v16 = vmul.f32 %v757_v1, %v757_v1  ;;  %v235_v45 = vmul.f32 %v762_v2, %v762_v2  ;;  %vm459_vm9 = vcmask 1043459  }
  0x38   :  { %s692_s21 = smov 113   ;;  %s693_s22 = smov 112   ;;  %v796_v9 = vand.u32 127, %v71_v6  ;;  %v221_v13 = vld [vmem:[#allocation6 + $0x40] sm:$0xff]  ;;  %v117_v23 = vld [vmem:[#allocation6 + $0x10] sm:$0xff]  ;;  %v225_v24 = vld [vmem:[#allocation6 + $0xd8] sm:$0xff]  ;;  %v817_v29 = vmul.f32 %v222_v14, %v757_v1  ;;  %v833_v44 = vmul.f32 %v222_v14, %v762_v2  ;;  %v234_v46 = vmul.f32 %v764_v3, %v764_v3 }
  0x39   :  { %s694_s23 = smov 111   ;;  %v695_v25 = vmov 1983009808   ;;  %v118_v27 = vld [vmem:[#allocation6 + $0x18] sm:$0xff]  ;;  %v814_v28 = vmul.f32 %v221_v13, %v752_v0  ;;  %v819_v30 = vmul.f32 %v236_v12, %v224_v15  ;;  %s821_s24 = sld [smem:[#allocation8]]  ;;  %v825_v31 = vld [vmem:[#allocation6 + $0xa0] sm:$0xff]  ;;  %v830_v43 = vmul.f32 %v237_v16, %v225_v24 }
  0x3a   :  { %vm111_vm0 = vcmp.lt.s32.totalorder %v796_v9, 16  ;;  %vm73_vm1 = vcmp.lt.s32.totalorder %v796_v9, 17  ;;  %v438_v26 = vunpack.c.l.s4 %v695_v25  ;;  %vm150_vm2 = vcmp.lt.s32.totalorder %v796_v9, 15  ;;  %s823_s25 = sld [smem:[#allocation8 + $0x1]]  ;;  %v78_v34 = vld [vmem:[#allocation6] sm:$0xff]  ;;  %v79_v35 = vld [vmem:[#allocation6 + $0x8] sm:$0xff] }
  0x3b   :  { %109 = vrot.lane.b32.xlu1 %v757_v1, %s685_s26  ;;  %69 = vrot.lane.b32.xlu0 %v757_v1, %s688_s1  ;;  %vm189_vm3 = vcmp.lt.s32.totalorder %v796_v9, 1  ;;  %v828_v38 = vld [vmem:[#allocation6 + $0xa8] sm:$0xff]  ;;  %v81_v39 = vld [vmem:[#allocation6 + $0x90] sm:$0xff]  ;;  %v82_v40 = vld [vmem:[#allocation6 + $0x98] sm:$0xff]  ;;  %v441_v50 = vshrl.u32 %v71_v6, 7  ;;  %v845_v63 = vmul.f32 %v235_v45, %v225_v24  ;;  %v858_v6 = vmul.f32 %v234_v46, %v224_v15  ;;  %s697_s28 = smov [#allocation10]  }
  0x3c   :  { %v439_v49 = vunpack.c.0.s8 %v438_v26  ;;  %vm254_vm4 = vcmp.lt.s32.totalorder %v796_v9, 127  ;;  %vm293_vm5 = vcmp.lt.s32.totalorder %v796_v9, 113  ;;  %vm332_vm6 = vcmp.lt.s32.totalorder %v796_v9, 112  ;;  %s542_s29 = sshll.u32 %s697_s28, 4  ;;  %s543_s29 = int_to_ptr.vmem [resolvable:$true] %s542_s29 }
  0x3d   :  { %vm371_vm7 = vcmp.lt.s32.totalorder %v796_v9, 111  ;;  %vm461_vm10 = vcmask 1045509   ;;  %vm463_vm11 = vcmask 1047559  }
  0x3f   :  { %67 = vrot.lane.b32.xlu1 %v762_v2, %s688_s1  ;;  %63 = vrot.lane.b32.xlu0 %v764_v3, %s688_s1 }
  0x43   :  { %107 = vrot.lane.b32.xlu1 %v762_v2, %s685_s26  ;;  %103 = vrot.lane.b32.xlu0 %v764_v3, %s685_s26  ;;  %s696_s26 = smov [#allocation9]  }
  0x44   :  { %s532_s27 = sshll.u32 %s696_s26, 4  ;;  %s533_s27 = int_to_ptr.vmem [resolvable:$true] %s532_s27 }
  0x45   :  { %s629_s30 = scalar_lea.vmem %s533_s27, 64  ;;  %p634_p8 = scmp.lt.s32.totalorder %s533_s27, %s533_s27 }
  0x46   :  { %p630_p7 = scmp.ne.s32.totalorder %s533_s27, %s629_s30  ;;  %p635_p9 = scmp.lt.s32.totalorder %s629_s30, %s629_s30 }
  0x47   :  { %148 = vrot.lane.b32.xlu1 %v757_v1, %s689_s18  ;;  %144 = vrot.lane.b32.xlu0 %v752_v0, %s689_s18 }
  0x48   :  { %p636_p10 = por %p635_p9, %p634_p8 }
  0x4a   :  { %p637_p11 = pnand %p636_p10, %p630_p7 }
  0x4b   :  { %146 = vrot.lane.b32.xlu1 %v762_v2, %s689_s18  ;;  %142 = vrot.lane.b32.xlu0 %v764_v3, %s689_s18 }
  0x4f   :  { %187 = vrot.lane.b32.xlu1 %v757_v1, %s690_s19  ;;  %183 = vrot.lane.b32.xlu0 %v752_v0, %s690_s19 }
  0x53   :  { %185 = vrot.lane.b32.xlu1 %v762_v2, %s690_s19  ;;  %181 = vrot.lane.b32.xlu0 %v764_v3, %s690_s19 }
  0x57   :  { %252 = vrot.lane.b32.xlu1 %v757_v1, %s691_s20  ;;  %248 = vrot.lane.b32.xlu0 %v752_v0, %s691_s20 }
  0x5b   :  { %250 = vrot.lane.b32.xlu1 %v762_v2, %s691_s20  ;;  %246 = vrot.lane.b32.xlu0 %v764_v3, %s691_s20 }
  0x5f   :  { %291 = vrot.lane.b32.xlu1 %v757_v1, %s692_s21  ;;  %287 = vrot.lane.b32.xlu0 %v752_v0, %s692_s21 }
  0x63   :  { %289 = vrot.lane.b32.xlu1 %v762_v2, %s692_s21  ;;  %285 = vrot.lane.b32.xlu0 %v764_v3, %s692_s21 }
  0x67   :  { %330 = vrot.lane.b32.xlu1 %v757_v1, %s693_s22  ;;  %326 = vrot.lane.b32.xlu0 %v752_v0, %s693_s22 }
  0x6b   :  { %328 = vrot.lane.b32.xlu1 %v762_v2, %s693_s22  ;;  %324 = vrot.lane.b32.xlu0 %v764_v3, %s693_s22 }
  0x6f   :  { %369 = vrot.lane.b32.xlu1 %v757_v1, %s694_s23  ;;  %365 = vrot.lane.b32.xlu0 %v752_v0, %s694_s23  ;;  %v848_v0 = vmul.f32 %v221_v13, %v764_v3 }
  0x73   :  { %367 = vrot.lane.b32.xlu1 %v762_v2, %s694_s23  ;;  %363 = vrot.lane.b32.xlu0 %v764_v3, %s694_s23  ;;  %v866_v3 = vsub.s32 %v439_v49, %v441_v50 }
  0xa9   :  { %v106_v4 = vpop.permute.xlu1 %105  ;;  %v66_v5 = vpop.permute.xlu0 %65 }
  0xad   :  { %v110_v7 = vpop.permute.xlu1 %109  ;;  %v70_v8 = vpop.permute.xlu0 %69 }
  0xae   :  { %v113_v17 = vsel %vm111_vm0, %v106_v4, %v110_v7  ;;  %v115_v18 = vsel %vm111_vm0, %v110_v7, %v106_v4  ;;  %v75_v19 = vsel %vm73_vm1, %v66_v5, %v70_v8  ;;  %v77_v20 = vsel %vm73_vm1, %v70_v8, %v66_v5 }
  0xaf   :  { %v132_v32 = vmul.f32 %v115_v18, %v115_v18  ;;  %v133_v33 = vmul.f32 %v113_v17, %v113_v17  ;;  %v93_v36 = vmul.f32 %v77_v20, %v77_v20  ;;  %v94_v37 = vmul.f32 %v75_v19, %v75_v19 }
  0xb0   :  { %v124_v51 = vmul.f32 %v117_v23, %v115_v18  ;;  %v125_v52 = vmul.f32 %v118_v27, %v113_v17  ;;  %v85_v53 = vmul.f32 %v78_v34, %v77_v20  ;;  %v86_v54 = vmul.f32 %v79_v35, %v75_v19  ;;  %v156_v17 = vld [vmem:[#allocation6 + $0x20] sm:$0xff]  ;;  %v157_v18 = vld [vmem:[#allocation6 + $0x28] sm:$0xff] }
  0xb1   :  { %v68_v10 = vpop.permute.xlu1 %67  ;;  %v64_v11 = vpop.permute.xlu0 %63  ;;  %v136_v55 = vmul.f32 %v132_v32, %v825_v31  ;;  %v137_v56 = vmul.f32 %v133_v33, %v828_v38  ;;  %v97_v57 = vmul.f32 %v93_v36, %v81_v39  ;;  %v98_v58 = vmul.f32 %v94_v37, %v82_v40  ;;  %v159_v32 = vld [vmem:[#allocation6 + $0xb0] sm:$0xff]  ;;  %v160_v33 = vld [vmem:[#allocation6 + $0xb8] sm:$0xff] }
  0xb2   :  { %v74_v47 = vsel %vm73_vm1, %v64_v11, %v68_v10  ;;  %v76_v48 = vsel %vm73_vm1, %v68_v10, %v64_v11  ;;  %v861_v7 = vstv %s821_s24  ;;  %v864_v8 = vstv %s823_s25 }
  0xb3   :  { %v91_v59 = vmul.f32 %v76_v48, %v76_v48  ;;  %v92_v60 = vmul.f32 %v74_v47, %v74_v47  ;;  %v128_v10 = vadd.f32 %v124_v51, %v85_v53  ;;  %v129_v11 = vadd.f32 %v125_v52, %v86_v54 }
  0xb4   :  { %v140_v12 = vadd.f32 %v136_v55, %v97_v57  ;;  %v141_v13 = vadd.f32 %v137_v56, %v98_v58  ;;  %v83_v15 = vmul.f32 %v78_v34, %v76_v48  ;;  %v84_v24 = vmul.f32 %v79_v35, %v74_v47  ;;  %v198_v55 = vld [vmem:[#allocation6 + $0xc0] sm:$0xff]  ;;  %v199_v56 = vld [vmem:[#allocation6 + $0xc8] sm:$0xff] }
  0xb5   :  { %v108_v21 = vpop.permute.xlu1 %107  ;;  %v104_v22 = vpop.permute.xlu0 %103  ;;  %v95_v25 = vmul.f32 %v91_v59, %v81_v39  ;;  %v96_v26 = vmul.f32 %v92_v60, %v82_v40  ;;  %v195_v39 = vld [vmem:[#allocation6 + $0x30] sm:$0xff]  ;;  %v196_v40 = vld [vmem:[#allocation6 + $0x38] sm:$0xff] }
  0xb6   :  { %v112_v1 = vsel %vm111_vm0, %v104_v22, %v108_v21  ;;  %v114_v2 = vsel %vm111_vm0, %v108_v21, %v104_v22 }
  0xb7   :  { %v122_v14 = vmul.f32 %v117_v23, %v114_v2  ;;  %v123_v16 = vmul.f32 %v118_v27, %v112_v1 }
  0xb9   :  { %v149_v41 = vpop.permute.xlu1 %148  ;;  %v145_v42 = vpop.permute.xlu0 %144  ;;  %v126_v45 = vadd.f32 %v122_v14, %v83_v15  ;;  %v127_v46 = vadd.f32 %v123_v16, %v84_v24 }
  0xba   :  { %v152_v4 = vsel %vm150_vm2, %v145_v42, %v149_v41  ;;  %v154_v5 = vsel %vm150_vm2, %v149_v41, %v145_v42  ;;  %v130_v41 = vmul.f32 %v114_v2, %v114_v2  ;;  %v131_v42 = vmul.f32 %v112_v1, %v112_v1 }
  0xbb   :  { %v171_v19 = vmul.f32 %v154_v5, %v154_v5  ;;  %v172_v20 = vmul.f32 %v152_v4, %v152_v4  ;;  %v163_v34 = vmul.f32 %v156_v17, %v154_v5  ;;  %v164_v35 = vmul.f32 %v157_v18, %v152_v4 }
  0xbd   :  { %v147_v61 = vpop.permute.xlu1 %146  ;;  %v143_v62 = vpop.permute.xlu0 %142  ;;  %v175_v47 = vmul.f32 %v171_v19, %v159_v32  ;;  %v176_v48 = vmul.f32 %v172_v20, %v160_v33  ;;  %v167_v1 = vadd.f32 %v163_v34, %v128_v10  ;;  %v168_v2 = vadd.f32 %v164_v35, %v129_v11  ;;  %v260_v35 = vld [vmem:[#allocation6 + $0x50] sm:$0xff] }
  0xbe   :  { %v151_v36 = vsel %vm150_vm2, %v143_v62, %v147_v61  ;;  %v153_v23 = vsel %vm150_vm2, %v147_v61, %v143_v62  ;;  %v134_v61 = vmul.f32 %v130_v41, %v825_v31  ;;  %v135_v62 = vmul.f32 %v131_v42, %v828_v38 }
  0xbf   :  { %v169_v51 = vmul.f32 %v153_v23, %v153_v23  ;;  %v170_v52 = vmul.f32 %v151_v36, %v151_v36  ;;  %v179_v4 = vadd.f32 %v175_v47, %v140_v12  ;;  %v180_v5 = vadd.f32 %v176_v48, %v141_v13  ;;  %v261_v47 = vld [vmem:[#allocation6 + $0x58] sm:$0xff] }
  0xc0   :  { %v161_v14 = vmul.f32 %v156_v17, %v153_v23  ;;  %v162_v16 = vmul.f32 %v157_v18, %v151_v36  ;;  %v138_v12 = vadd.f32 %v134_v61, %v95_v25  ;;  %v139_v13 = vadd.f32 %v135_v62, %v96_v26 }
  0xc1   :  { %v188_v21 = vpop.permute.xlu1 %187  ;;  %v184_v22 = vpop.permute.xlu0 %183 }
  0xc2   :  { %v191_v27 = vsel %vm189_vm3, %v184_v22, %v188_v21  ;;  %v193_v37 = vsel %vm189_vm3, %v188_v21, %v184_v22  ;;  %v165_v17 = vadd.f32 %v161_v14, %v126_v45  ;;  %v166_v18 = vadd.f32 %v162_v16, %v127_v46  ;;  %v263_v45 = vld [vmem:[#allocation6 + $0xe0] sm:$0xff]  ;;  %v264_v46 = vld [vmem:[#allocation6 + $0xe8] sm:$0xff] }
  0xc3   :  { %v210_v53 = vmul.f32 %v193_v37, %v193_v37  ;;  %v211_v54 = vmul.f32 %v191_v27, %v191_v27  ;;  %v202_v57 = vmul.f32 %v195_v39, %v193_v37  ;;  %v203_v58 = vmul.f32 %v196_v40, %v191_v27 }
  0xc4   :  { %v173_v27 = vmul.f32 %v169_v51, %v159_v32  ;;  %v174_v37 = vmul.f32 %v170_v52, %v160_v33 }
  0xc5   :  { %v186_v49 = vpop.permute.xlu1 %185  ;;  %v182_v50 = vpop.permute.xlu0 %181  ;;  %v214_v21 = vmul.f32 %v210_v53, %v198_v55  ;;  %v215_v22 = vmul.f32 %v211_v54, %v199_v56  ;;  %v207_v31 = vadd.f32 %v203_v58, %v168_v2 }
  0xc6   :  { %v190_v59 = vsel %vm189_vm3, %v182_v50, %v186_v49  ;;  %v192_v60 = vsel %vm189_vm3, %v186_v49, %v182_v50  ;;  %v206_v49 = vadd.f32 %v202_v57, %v167_v1 }
  0xc7   :  { %v208_v15 = vmul.f32 %v192_v60, %v192_v60  ;;  %v209_v24 = vmul.f32 %v190_v59, %v190_v59  ;;  %v200_v41 = vmul.f32 %v195_v39, %v192_v60  ;;  %v201_v38 = vmul.f32 %v196_v40, %v190_v59 }
  0xc8   :  { %v218_v42 = vadd.f32 %v214_v21, %v179_v4  ;;  %v219_v34 = vadd.f32 %v215_v22, %v180_v5  ;;  %v177_v39 = vadd.f32 %v173_v27, %v138_v12  ;;  %v178_v40 = vadd.f32 %v174_v37, %v139_v13  ;;  %v299_v22 = vld [vmem:[#allocation6 + $0x60] sm:$0xff] }
  0xc9   :  { %v253_v19 = vpop.permute.xlu1 %252  ;;  %v249_v20 = vpop.permute.xlu0 %248  ;;  %v212_v32 = vmul.f32 %v208_v15, %v198_v55  ;;  %v213_v33 = vmul.f32 %v209_v24, %v199_v56  ;;  %v204_v51 = vadd.f32 %v200_v41, %v165_v17  ;;  %v205_v52 = vadd.f32 %v201_v38, %v166_v18 }
  0xca   :  { %v256_v10 = vsel %vm254_vm4, %v249_v20, %v253_v19  ;;  %v258_v11 = vsel %vm254_vm4, %v253_v19, %v249_v20  ;;  %v232_v25 = vadd.f32 %v814_v28, %v206_v49  ;;  %v233_v26 = vadd.f32 %v817_v29, %v207_v31 }
  0xcb   :  { %v275_v48 = vmul.f32 %v256_v10, %v256_v10  ;;  %v276_v50 = vmul.f32 %v258_v11, %v258_v11  ;;  %v267_v53 = vmul.f32 %v260_v35, %v256_v10  ;;  %v268_v54 = vmul.f32 %v261_v47, %v258_v11  ;;  %v302_v10 = vld [vmem:[#allocation6 + $0xf0] sm:$0xff]  ;;  %v303_v11 = vld [vmem:[#allocation6 + $0xf8] sm:$0xff] }
  0xcc   :  { %v216_v59 = vadd.f32 %v212_v32, %v177_v39  ;;  %v217_v60 = vadd.f32 %v213_v33, %v178_v40  ;;  %v244_v61 = vadd.f32 %v819_v30, %v218_v42  ;;  %v245_v28 = vadd.f32 %v830_v43, %v219_v34  ;;  %v300_v43 = vld [vmem:[#allocation6 + $0x68] sm:$0xff]  ;;  %v338_v39 = vld [vmem:[#allocation6 + $0x70] sm:$0xff] }
  0xcd   :  { %v251_v36 = vpop.permute.xlu1 %250  ;;  %v247_v23 = vpop.permute.xlu0 %246  ;;  %v279_v62 = vmul.f32 %v275_v48, %v263_v45  ;;  %v280_v29 = vmul.f32 %v276_v50, %v264_v46  ;;  %v231_v4 = vadd.f32 %v833_v44, %v205_v52  ;;  %v230_v5 = vadd.f32 %v848_v0, %v204_v51 }
  0xce   :  { %v255_v55 = vsel %vm254_vm4, %v247_v23, %v251_v36  ;;  %v257_v56 = vsel %vm254_vm4, %v251_v36, %v247_v23  ;;  %v271_v19 = vadd.f32 %v267_v53, %v232_v25  ;;  %v272_v20 = vadd.f32 %v268_v54, %v233_v26  ;;  %v341_v53 = vld [vmem:[#allocation6 + $0x100] sm:$0xff]  ;;  %v342_v54 = vld [vmem:[#allocation6 + $0x108] sm:$0xff] }
  0xcf   :  { %v273_v14 = vmul.f32 %v255_v55, %v255_v55  ;;  %v274_v16 = vmul.f32 %v257_v56, %v257_v56  ;;  %v265_v21 = vmul.f32 %v260_v35, %v255_v55  ;;  %v266_v30 = vmul.f32 %v261_v47, %v257_v56 }
  0xd0   :  { %v283_v31 = vadd.f32 %v279_v62, %v244_v61  ;;  %v284_v0 = vadd.f32 %v280_v29, %v245_v28  ;;  %v243_v41 = vadd.f32 %v845_v63, %v217_v60  ;;  %v242_v38 = vadd.f32 %v858_v6, %v216_v59  ;;  %v339_v63 = vld [vmem:[#allocation6 + $0x78] sm:$0xff] }
  0xd1   :  { %v292_v57 = vpop.permute.xlu1 %291  ;;  %v288_v58 = vpop.permute.xlu0 %287  ;;  %v277_v12 = vmul.f32 %v273_v14, %v263_v45  ;;  %v278_v13 = vmul.f32 %v274_v16, %v264_v46  ;;  %v269_v36 = vadd.f32 %v265_v21, %v230_v5  ;;  %v270_v23 = vadd.f32 %v266_v30, %v231_v4  ;;  %v377_v21 = vld [vmem:[#allocation6 + $0x80] sm:$0xff]  ;;  %v378_v30 = vld [vmem:[#allocation6 + $0x88] sm:$0xff] }
  0xd2   :  { %v295_v1 = vsel %vm293_vm5, %v288_v58, %v292_v57  ;;  %v297_v2 = vsel %vm293_vm5, %v292_v57, %v288_v58 }
  0xd3   :  { %v314_v27 = vmul.f32 %v295_v1, %v295_v1  ;;  %v315_v37 = vmul.f32 %v297_v2, %v297_v2  ;;  %v306_v17 = vmul.f32 %v299_v22, %v295_v1  ;;  %v307_v18 = vmul.f32 %v300_v43, %v297_v2 }
  0xd4   :  { %v281_v25 = vadd.f32 %v277_v12, %v242_v38  ;;  %v282_v26 = vadd.f32 %v278_v13, %v243_v41 }
  0xd5   :  { %v290_v15 = vpop.permute.xlu1 %289  ;;  %v286_v24 = vpop.permute.xlu0 %285  ;;  %v318_v35 = vmul.f32 %v314_v27, %v302_v10  ;;  %v319_v47 = vmul.f32 %v315_v37, %v303_v11  ;;  %v310_v45 = vadd.f32 %v306_v17, %v271_v19  ;;  %v311_v46 = vadd.f32 %v307_v18, %v272_v20 }
  0xd6   :  { %v294_v49 = vsel %vm293_vm5, %v286_v24, %v290_v15  ;;  %v296_v44 = vsel %vm293_vm5, %v290_v15, %v286_v24 }
  0xd7   :  { %v312_v42 = vmul.f32 %v294_v49, %v294_v49  ;;  %v313_v34 = vmul.f32 %v296_v44, %v296_v44  ;;  %v304_v48 = vmul.f32 %v299_v22, %v294_v49  ;;  %v305_v50 = vmul.f32 %v300_v43, %v296_v44 }
  0xd8   :  { %v322_v61 = vadd.f32 %v318_v35, %v283_v31  ;;  %v323_v28 = vadd.f32 %v319_v47, %v284_v0  ;;  %v380_v31 = vld [vmem:[#allocation6 + $0x110] sm:$0xff]  ;;  %v381_v0 = vld [vmem:[#allocation6 + $0x118] sm:$0xff] }
  0xd9   :  { %v331_v32 = vpop.permute.xlu1 %330  ;;  %v327_v33 = vpop.permute.xlu0 %326  ;;  %v316_v55 = vmul.f32 %v312_v42, %v302_v10  ;;  %v317_v56 = vmul.f32 %v313_v34, %v303_v11  ;;  %v308_v1 = vadd.f32 %v304_v48, %v269_v36  ;;  %v309_v2 = vadd.f32 %v305_v50, %v270_v23 }
  0xda   :  { %v334_v6 = vsel %vm332_vm6, %v327_v33, %v331_v32  ;;  %v336_v40 = vsel %vm332_vm6, %v331_v32, %v327_v33 }
  0xdb   :  { %v353_v51 = vmul.f32 %v334_v6, %v334_v6  ;;  %v354_v52 = vmul.f32 %v336_v40, %v336_v40  ;;  %v345_v57 = vmul.f32 %v338_v39, %v334_v6  ;;  %v346_v58 = vmul.f32 %v339_v63, %v336_v40 }
  0xdc   :  { %v320_v22 = vadd.f32 %v316_v55, %v281_v25  ;;  %v321_v43 = vadd.f32 %v317_v56, %v282_v26 }
  0xdd   :  { %v329_v59 = vpop.permute.xlu1 %328  ;;  %v325_v60 = vpop.permute.xlu0 %324  ;;  %v357_v4 = vmul.f32 %v353_v51, %v341_v53  ;;  %v358_v5 = vmul.f32 %v354_v52, %v342_v54  ;;  %v349_v15 = vadd.f32 %v345_v57, %v310_v45  ;;  %v350_v24 = vadd.f32 %v346_v58, %v311_v46 }
  0xde   :  { %v333_v62 = vsel %vm332_vm6, %v325_v60, %v329_v59  ;;  %v335_v29 = vsel %vm332_vm6, %v329_v59, %v325_v60 }
  0xdf   :  { %v343_v14 = vmul.f32 %v338_v39, %v333_v62  ;;  %v344_v16 = vmul.f32 %v339_v63, %v335_v29  ;;  %v351_v19 = vmul.f32 %v333_v62, %v333_v62  ;;  %v352_v20 = vmul.f32 %v335_v29, %v335_v29 }
  0xe0   :  { %v361_v17 = vadd.f32 %v357_v4, %v322_v61  ;;  %v362_v18 = vadd.f32 %v358_v5, %v323_v28 }
  0xe1   :  { %v370_v27 = vpop.permute.xlu1 %369  ;;  %v366_v37 = vpop.permute.xlu0 %365  ;;  %v355_v49 = vmul.f32 %v351_v19, %v341_v53  ;;  %v356_v44 = vmul.f32 %v352_v20, %v342_v54  ;;  %v347_v36 = vadd.f32 %v343_v14, %v308_v1  ;;  %v348_v23 = vadd.f32 %v344_v16, %v309_v2 }
  0xe2   :  { %v373_v41 = vsel %vm371_vm7, %v366_v37, %v370_v27  ;;  %v375_v38 = vsel %vm371_vm7, %v370_v27, %v366_v37 }
  0xe3   :  { %v384_v10 = vmul.f32 %v377_v21, %v373_v41  ;;  %v385_v11 = vmul.f32 %v378_v30, %v375_v38  ;;  %v392_v12 = vmul.f32 %v373_v41, %v373_v41  ;;  %v393_v13 = vmul.f32 %v375_v38, %v375_v38 }
  0xe4   :  { %v359_v39 = vadd.f32 %v355_v49, %v320_v22  ;;  %v360_v63 = vadd.f32 %v356_v44, %v321_v43 }
  0xe5   :  { %v388_v42 = vadd.f32 %v384_v10, %v349_v15  ;;  %v389_v34 = vadd.f32 %v385_v11, %v350_v24  ;;  %v396_v32 = vmul.f32 %v392_v12, %v380_v31  ;;  %v397_v33 = vmul.f32 %v393_v13, %v381_v0  ;;  %v368_v35 = vpop.permute.xlu1 %367  ;;  %v364_v47 = vpop.permute.xlu0 %363 }
  0xe6   :  { %v372_v6 = vsel %vm371_vm7, %v364_v47, %v368_v35  ;;  %v374_v40 = vsel %vm371_vm7, %v368_v35, %v364_v47 }
  0xe7   :  { %v400_v48 = vadd.f32 %v396_v32, %v361_v17  ;;  %v401_v50 = vadd.f32 %v397_v33, %v362_v18  ;;  %v414_v51 = vrot.slane %v388_v42, 4  ;;  %v420_v52 = vrot.slane %v389_v34, 4 }
  0xe8   :  { %v382_v25 = vmul.f32 %v377_v21, %v372_v6  ;;  %v383_v26 = vmul.f32 %v378_v30, %v374_v40  ;;  %v390_v45 = vmul.f32 %v372_v6, %v372_v6  ;;  %v391_v46 = vmul.f32 %v374_v40, %v374_v40 }
  0xe9   :  { %v415_v53 = vadd.f32 %v414_v51, %v388_v42  ;;  %v421_v54 = vadd.f32 %v420_v52, %v389_v34  ;;  %v479_v55 = vrot.slane %v400_v48, 4  ;;  %v485_v56 = vrot.slane %v401_v50, 4 }
  0xea   :  { %v386_v57 = vadd.f32 %v382_v25, %v347_v36  ;;  %v387_v58 = vadd.f32 %v383_v26, %v348_v23  ;;  %v394_v59 = vmul.f32 %v390_v45, %v380_v31  ;;  %v395_v60 = vmul.f32 %v391_v46, %v381_v0 }
  0xeb   :  { %v416_v61 = vrot.slane %v415_v53, 2  ;;  %v422_v28 = vrot.slane %v421_v54, 2  ;;  %v480_v9 = vadd.f32 %v479_v55, %v400_v48  ;;  %v486_v62 = vadd.f32 %v485_v56, %v401_v50 }
  0xec   :  { %v398_v29 = vadd.f32 %v394_v59, %v359_v39  ;;  %v399_v1 = vadd.f32 %v395_v60, %v360_v63  ;;  %v402_v2 = vrot.slane %v386_v57, 4  ;;  %v408_v4 = vrot.slane %v387_v58, 4 }
  0xed   :  { %v417_v5 = vadd.f32 %v416_v61, %v415_v53  ;;  %v423_v14 = vadd.f32 %v422_v28, %v421_v54  ;;  %v481_v16 = vrot.slane %v480_v9, 2  ;;  %v487_v19 = vrot.slane %v486_v62, 2 }
  0xee   :  { %v403_v20 = vadd.f32 %v402_v2, %v386_v57  ;;  %v409_v21 = vadd.f32 %v408_v4, %v387_v58  ;;  %v467_v30 = vrot.slane %v398_v29, 4  ;;  %v473_v22 = vrot.slane %v399_v1, 4 }
  0xef   :  { %v418_v43 = vrot.slane %v417_v5, 1  ;;  %v424_v15 = vrot.slane %v423_v14, 1  ;;  %v482_v24 = vadd.f32 %v481_v16, %v480_v9  ;;  %v488_v27 = vadd.f32 %v487_v19, %v486_v62 }
  0xf0   :  { %v404_v37 = vrot.slane %v403_v20, 2  ;;  %v410_v49 = vrot.slane %v409_v21, 2  ;;  %v468_v44 = vadd.f32 %v467_v30, %v398_v29  ;;  %v474_v31 = vadd.f32 %v473_v22, %v399_v1 }
  0xf1   :  { %v419_v0 = vadd.f32 %v418_v43, %v417_v5  ;;  %v425_v41 = vadd.f32 %v424_v15, %v423_v14  ;;  %v483_v38 = vrot.slane %v482_v24, 1  ;;  %v489_v10 = vrot.slane %v488_v27, 1 }
  0xf2   :  { %v405_v11 = vadd.f32 %v404_v37, %v403_v20  ;;  %v411_v12 = vadd.f32 %v410_v49, %v409_v21  ;;  %v469_v13 = vrot.slane %v468_v44, 2  ;;  %v475_v17 = vrot.slane %v474_v31, 2 }
  0xf3   :  { %v430_v18 = vadd.f32 %v861_v7, %v419_v0  ;;  %v431_v36 = vadd.f32 %v861_v7, %v425_v41  ;;  %v484_v23 = vadd.f32 %v483_v38, %v482_v24  ;;  %v490_v42 = vadd.f32 %v489_v10, %v488_v27 }
  0xf4   :  { %v406_v34 = vrot.slane %v405_v11, 1  ;;  %v412_v32 = vrot.slane %v411_v12, 1  ;;  %v470_v33 = vadd.f32 %v469_v13, %v468_v44  ;;  %v476_v35 = vadd.f32 %v475_v17, %v474_v31 }
  0xf5   :  { %v444_v47 = vcombine.low %v430_v18, %v431_v36  ;;  %v495_v39 = vadd.f32 %v864_v8, %v484_v23  ;;  %v496_v63 = vadd.f32 %v864_v8, %v490_v42 }
  0xf6   :  { %v407_v6 = vadd.f32 %v406_v34, %v405_v11  ;;  %v413_v40 = vadd.f32 %v412_v32, %v411_v12  ;;  %v471_v48 = vrot.slane %v470_v33, 1  ;;  %v477_v50 = vrot.slane %v476_v35, 1 }
  0xf7   :  { %v451_v51 = vrot.slane %v444_v47, %v866_v3  ;;  %v509_v52 = vcombine.low %v495_v39, %v496_v63 }
  0xf8   :  { %v428_v25 = vadd.f32 %v861_v7, %v407_v6  ;;  %v429_v26 = vadd.f32 %v861_v7, %v413_v40  ;;  %v472_v45 = vadd.f32 %v471_v48, %v470_v33  ;;  %v478_v46 = vadd.f32 %v477_v50, %v476_v35 }
  0xf9   :  { %v516_v56 = vrot.slane %v509_v52, %v866_v3  ;;  %v456_v58 = vrot.slane %v451_v51, 7 }
  0xfa   :  { %v493_v53 = vadd.f32 %v864_v8, %v472_v45  ;;  %v494_v54 = vadd.f32 %v864_v8, %v478_v46  ;;  %v436_v55 = vcombine.low %v428_v25, %v429_v26 }
  0xfb   :  { %v519_v61 = vrot.slane %v516_v56, 7 }
  0xfc   :  { %v443_v57 = vrot.slane %v436_v55, %v866_v3  ;;  %v501_v59 = vcombine.low %v493_v53, %v494_v54 }
  0xfe   :  { %v458_v7 = vsel %vm457_vm8, %v456_v58, %v443_v57  ;;  %v508_v60 = vrot.slane %v501_v59, %v866_v3 }
  0xff   :  { %v460_v8 = vsel %vm459_vm9, %v456_v58, %v458_v7 }
 0x100   :  { %v462_v28 = vsel %vm461_vm10, %v456_v58, %v460_v8  ;;  %v520_v9 = vsel %vm457_vm8, %v519_v61, %v508_v60 }
 0x101   :  { %v464_v62 = vsel %vm463_vm11, %v456_v58, %v462_v28  ;;  %v521_v29 = vsel %vm459_vm9, %v519_v61, %v520_v9 }
 0x102   :  { %466 = vst [vmem:[#allocation9] sm:$0xf] %v464_v62  ;;  %v522_v1 = vsel %vm461_vm10, %v519_v61, %v521_v29 }
 0x103   :  { %640 = shalt.err (!%p637_p11)
}
 0x104   :  { %s641_s7 = scalar_lea.hbm %s973_s3, 64 }
 0x105   :  { %p642_p12 = scmp.ne.s32.totalorder %s973_s3, %s641_s7  ;;  %p645_p13 = scmp.lt.u32.totalorder %s641_s7, %s973_s3 }
 0x107   :  { %p647_p0 = pnand %p645_p13, %p642_p12 }
 0x109   :  { %650 = shalt.err (!%p647_p0)
}
 0x10a   :  { %535 = dma.vmem_to_hbm [thread:$0]  %s533_s27, 64, %s973_s3, [#allocation4]   ;;  %v523_v3 = vsel %vm463_vm11, %v519_v61, %v522_v1 }
 0x10b   :  { %525 = vst [vmem:[#allocation10] sm:$0xf] %v523_v3  ;;  %s651_s14 = scalar_lea.vmem %s543_s29, 64  ;;  %p656_p2 = scmp.lt.s32.totalorder %s543_s29, %s543_s29 }
 0x10c   :  { %p652_p1 = scmp.ne.s32.totalorder %s543_s29, %s651_s14  ;;  %p657_p3 = scmp.lt.s32.totalorder %s651_s14, %s651_s14 }
 0x10e   :  { %p658_p4 = por %p657_p3, %p656_p2 }
 0x110   :  { %p659_p5 = pnand %p658_p4, %p652_p1 }
 0x112   :  { %662 = shalt.err (!%p659_p5)
}
 0x113   :  { %s663_s15 = scalar_lea.hbm %s974_s4, 64 }
 0x114   :  { %p664_p6 = scmp.ne.s32.totalorder %s974_s4, %s663_s15  ;;  %p667_p7 = scmp.lt.u32.totalorder %s663_s15, %s974_s4 }
 0x116   :  { %p669_p8 = pnand %p667_p7, %p664_p6 }
 0x118   :  { %672 = shalt.err (!%p669_p8)
}
 0x119   :  { %545 = dma.vmem_to_hbm [thread:$0]  %s543_s29, 64, %s974_s4, [#allocation11]  }
 0x11a   :  { %679 = dma.done.wait [#allocation4], 64  }
 0x11b   :  { %680 = vsyncadd [#allocation4], 4294967232 }
 0x11c   :  { %681 = dma.done.wait [#allocation11], 64  }
 0x11d   :  { %682 = vsyncadd [#allocation11], 4294967232 }
 0x11e   :  { %552 = vsyncpa [#allocation3], 1 }
 0x11f   :  { %553 = vsyncpa [#allocation7], 1 }
 0x120   :  { %554 = vsyncpa [#allocation4], 1 }
 0x121   :  { %555 = vsyncpa [#allocation11], 1 }
 0x122   :  { %556 = vsyncpa [#allocation5], 1 }

// kernel: tpu_custom_call.1
= control target key start
LH: loop header
LB: loop body
LE: loop exit
PB: predicated region body
PF: predicated region fallthrough
CT: control target
= control target key end

     0   :  { %10 = vsyncpa [#allocation3], 0  ;;  %s970_s0 = inlined_call_operand.hbm [shape: f32[2,8,256], index: 0, kind: input, shape index: {}]   ;;  %s971_s1 = inlined_call_operand.hbm [shape: f32[2,9,8,256], index: 1, kind: input, shape index: {}]   ;;  %s972_s2 = inlined_call_operand.vmem [shape: f32[2], index: 2, kind: input, shape index: {}]   ;;  %s973_s3 = inlined_call_operand.hbm [shape: f32[2,256], index: 3, kind: output, shape index: {0}]   ;;  %s974_s4 = inlined_call_operand.hbm [shape: f32[2,256], index: 4, kind: output, shape index: {1}]  }
   0x1   :  { %11 = vsyncpa [#allocation7], 0 }
   0x2   :  { %12 = vsyncpa [#allocation5], 0 }
   0x3   :  { %13 = vsyncpa [#allocation4], 0 }
   0x4   :  { %14 = vsyncpa [#allocation11], 0  ;;  %s683_s15 = smov [#allocation2]   ;;  %s573_s19 = scalar_lea.hbm %s970_s0, 512 }
   0x5   :  { %s20_s16 = sshll.u32 %s683_s15, 4  ;;  %p574_p0 = scmp.ne.s32.totalorder %s970_s0, %s573_s19  ;;  %s21_s16 = int_to_ptr.vmem [resolvable:$true] %s20_s16 }
   0x6   :  { %p577_p1 = scmp.lt.u32.totalorder %s573_s19, %s970_s0 }
   0x8   :  { %p579_p2 = pnand %p577_p1, %p574_p0 }
   0xa   :  { %582 = shalt.err (!%p579_p2)
}
   0xb   :  { %s583_s24 = scalar_lea.vmem %s21_s16, 512  ;;  %p588_p4 = scmp.lt.s32.totalorder %s21_s16, %s21_s16 }
   0xc   :  { %p584_p3 = scmp.ne.s32.totalorder %s21_s16, %s583_s24  ;;  %p589_p5 = scmp.lt.s32.totalorder %s583_s24, %s583_s24 }
   0xe   :  { %p590_p6 = por %p589_p5, %p588_p4 }
  0x10   :  { %p591_p7 = pnand %p590_p6, %p584_p3 }
  0x12   :  { %594 = shalt.err (!%p591_p7)
}
  0x13   :  { %s684_s25 = smov 256   ;;  %s685_s26 = smov 16  }
  0x14   :  { %26 = dma.hbm_to_vmem [thread:$0]  %s970_s0, 512, %s21_s16, [#allocation3], %s684_s25, %s684_s25, %s685_s26  }
  0x15   :  { %s686_s29 = smov [#allocation6]   ;;  %s45_s7 = sshll.u32 %s972_s2, 4  ;;  %s46_s7 = int_to_ptr.vmem [resolvable:$true] %s45_s7 }
  0x16   :  { %s32_s30 = sshll.u32 %s686_s29, 4  ;;  %s595_s10 = scalar_lea.hbm %s971_s1, 4608  ;;  %s33_s30 = int_to_ptr.vmem [resolvable:$true] %s32_s30 }
  0x17   :  { %p596_p8 = scmp.ne.s32.totalorder %s971_s1, %s595_s10  ;;  %p599_p9 = scmp.lt.u32.totalorder %s595_s10, %s971_s1 }
  0x19   :  { %p601_p10 = pnand %p599_p9, %p596_p8 }
  0x1b   :  { %604 = shalt.err (!%p601_p10)
}
  0x1c   :  { %s605_s0 = scalar_lea.vmem %s33_s30, 4608  ;;  %p610_p12 = scmp.lt.s32.totalorder %s33_s30, %s33_s30 }
  0x1d   :  { %p606_p11 = scmp.ne.s32.totalorder %s33_s30, %s605_s0  ;;  %p611_p13 = scmp.lt.s32.totalorder %s605_s0, %s605_s0 }
  0x1f   :  { %p612_p0 = por %p611_p13, %p610_p12 }
  0x21   :  { %p613_p1 = pnand %p612_p0, %p606_p11 }
  0x23   :  { %616 = shalt.err (!%p613_p1)
}
  0x24   :  { %38 = dma.hbm_to_vmem [thread:$0]  %s971_s1, 4608, %s33_s30, [#allocation7], %s684_s25, %s684_s25, %s685_s26  }
  0x25   :  { %s617_s16 = scalar_lea.vmem %s46_s7, 16  ;;  %p622_p3 = scmp.lt.s32.totalorder %s46_s7, %s46_s7 }
  0x26   :  { %p618_p2 = scmp.ne.s32.totalorder %s46_s7, %s617_s16  ;;  %p623_p4 = scmp.lt.s32.totalorder %s617_s16, %s617_s16 }
  0x28   :  { %p624_p5 = por %p623_p4, %p622_p3 }
  0x2a   :  { %p625_p6 = pnand %p624_p5, %p618_p2 }
  0x2c   :  { %628 = shalt.err (!%p625_p6)
}
  0x2d   :  { %s687_s17 = smov [#allocation8]  }
  0x2e   :  { %48 = dma.vmem_to_smem %s46_s7, 16, %s687_s17, [#allocation5]  }
  0x2f   :  { %673 = dma.done.wait [#allocation3], 512  }
  0x30   :  { %674 = vsyncadd [#allocation3], 4294966784 }
  0x31   :  { %675 = dma.done.wait [#allocation7], 4608  }
  0x32   :  { %676 = vsyncadd [#allocation7], 4294962688 }
  0x33   :  { %677 = dma.done.wait [#allocation5], 16  }
  0x34   :  { %678 = vsyncadd [#allocation5], 4294967280 }
  0x35   :  { %58 = sfence }
  0x36   :  { %v752_v0 = vld [vmem:[#allocation2 + $0x10] sm:$0xff]  ;;  %s688_s1 = smov 17   ;;  %v757_v1 = vld [vmem:[#allocation2 + $0x18] sm:$0xff]  ;;  %v762_v2 = vld [vmem:[#allocation2 + $0x8] sm:$0xff]  ;;  %s689_s18 = smov 15   ;;  %v71_v6 = vlaneseq  ;;  %vm457_vm8 = vcmask 1041409  }
  0x37   :  { %105 = vrot.lane.b32.xlu1 %v752_v0, %s685_s26  ;;  %65 = vrot.lane.b32.xlu0 %v752_v0, %s688_s1  ;;  %v764_v3 = vld [vmem:[#allocation2] sm:$0xff]  ;;  %s690_s19 = smov 1   ;;  %s691_s20 = smov 127   ;;  %v236_v12 = vmul.f32 %v752_v0, %v752_v0  ;;  %v222_v14 = vld [vmem:[#allocation6 + $0x48] sm:$0xff]  ;;  %v224_v15 = vld [vmem:[#allocation6 + $0xd0] sm:$0xff]  ;;  %v237_v16 = vmul.f32 %v757_v1, %v757_v1  ;;  %v235_v45 = vmul.f32 %v762_v2, %v762_v2  ;;  %vm459_vm9 = vcmask 1043459  }
  0x38   :  { %s692_s21 = smov 113   ;;  %s693_s22 = smov 112   ;;  %v796_v9 = vand.u32 127, %v71_v6  ;;  %v221_v13 = vld [vmem:[#allocation6 + $0x40] sm:$0xff]  ;;  %v117_v23 = vld [vmem:[#allocation6 + $0x10] sm:$0xff]  ;;  %v225_v24 = vld [vmem:[#allocation6 + $0xd8] sm:$0xff]  ;;  %v817_v29 = vmul.f32 %v222_v14, %v757_v1  ;;  %v833_v44 = vmul.f32 %v222_v14, %v762_v2  ;;  %v234_v46 = vmul.f32 %v764_v3, %v764_v3 }
  0x39   :  { %s694_s23 = smov 111   ;;  %v695_v25 = vmov 1983009808   ;;  %v118_v27 = vld [vmem:[#allocation6 + $0x18] sm:$0xff]  ;;  %v814_v28 = vmul.f32 %v221_v13, %v752_v0  ;;  %v819_v30 = vmul.f32 %v236_v12, %v224_v15  ;;  %s821_s24 = sld [smem:[#allocation8]]  ;;  %v825_v31 = vld [vmem:[#allocation6 + $0xa0] sm:$0xff]  ;;  %v830_v43 = vmul.f32 %v237_v16, %v225_v24 }
  0x3a   :  { %vm111_vm0 = vcmp.lt.s32.totalorder %v796_v9, 16  ;;  %vm73_vm1 = vcmp.lt.s32.totalorder %v796_v9, 17  ;;  %v438_v26 = vunpack.c.l.s4 %v695_v25  ;;  %vm150_vm2 = vcmp.lt.s32.totalorder %v796_v9, 15  ;;  %s823_s25 = sld [smem:[#allocation8 + $0x1]]  ;;  %v78_v34 = vld [vmem:[#allocation6] sm:$0xff]  ;;  %v79_v35 = vld [vmem:[#allocation6 + $0x8] sm:$0xff] }
  0x3b   :  { %109 = vrot.lane.b32.xlu1 %v757_v1, %s685_s26  ;;  %69 = vrot.lane.b32.xlu0 %v757_v1, %s688_s1  ;;  %vm189_vm3 = vcmp.lt.s32.totalorder %v796_v9, 1  ;;  %v828_v38 = vld [vmem:[#allocation6 + $0xa8] sm:$0xff]  ;;  %v81_v39 = vld [vmem:[#allocation6 + $0x90] sm:$0xff]  ;;  %v82_v40 = vld [vmem:[#allocation6 + $0x98] sm:$0xff]  ;;  %v441_v50 = vshrl.u32 %v71_v6, 7  ;;  %v845_v63 = vmul.f32 %v235_v45, %v225_v24  ;;  %v858_v6 = vmul.f32 %v234_v46, %v224_v15  ;;  %s697_s28 = smov [#allocation10]  }
  0x3c   :  { %v439_v49 = vunpack.c.0.s8 %v438_v26  ;;  %vm254_vm4 = vcmp.lt.s32.totalorder %v796_v9, 127  ;;  %vm293_vm5 = vcmp.lt.s32.totalorder %v796_v9, 113  ;;  %vm332_vm6 = vcmp.lt.s32.totalorder %v796_v9, 112  ;;  %s542_s29 = sshll.u32 %s697_s28, 4  ;;  %s543_s29 = int_to_ptr.vmem [resolvable:$true] %s542_s29 }
  0x3d   :  { %vm371_vm7 = vcmp.lt.s32.totalorder %v796_v9, 111  ;;  %vm461_vm10 = vcmask 1045509   ;;  %vm463_vm11 = vcmask 1047559  }
  0x3f   :  { %67 = vrot.lane.b32.xlu1 %v762_v2, %s688_s1  ;;  %63 = vrot.lane.b32.xlu0 %v764_v3, %s688_s1 }
  0x43   :  { %107 = vrot.lane.b32.xlu1 %v762_v2, %s685_s26  ;;  %103 = vrot.lane.b32.xlu0 %v764_v3, %s685_s26  ;;  %s696_s26 = smov [#allocation9]  }
  0x44   :  { %s532_s27 = sshll.u32 %s696_s26, 4  ;;  %s533_s27 = int_to_ptr.vmem [resolvable:$true] %s532_s27 }
  0x45   :  { %s629_s30 = scalar_lea.vmem %s533_s27, 64  ;;  %p634_p8 = scmp.lt.s32.totalorder %s533_s27, %s533_s27 }
  0x46   :  { %p630_p7 = scmp.ne.s32.totalorder %s533_s27, %s629_s30  ;;  %p635_p9 = scmp.lt.s32.totalorder %s629_s30, %s629_s30 }
  0x47   :  { %148 = vrot.lane.b32.xlu1 %v757_v1, %s689_s18  ;;  %144 = vrot.lane.b32.xlu0 %v752_v0, %s689_s18 }
  0x48   :  { %p636_p10 = por %p635_p9, %p634_p8 }
  0x4a   :  { %p637_p11 = pnand %p636_p10, %p630_p7 }
  0x4b   :  { %146 = vrot.lane.b32.xlu1 %v762_v2, %s689_s18  ;;  %142 = vrot.lane.b32.xlu0 %v764_v3, %s689_s18 }
  0x4f   :  { %187 = vrot.lane.b32.xlu1 %v757_v1, %s690_s19  ;;  %183 = vrot.lane.b32.xlu0 %v752_v0, %s690_s19 }
  0x53   :  { %185 = vrot.lane.b32.xlu1 %v762_v2, %s690_s19  ;;  %181 = vrot.lane.b32.xlu0 %v764_v3, %s690_s19 }
  0x57   :  { %252 = vrot.lane.b32.xlu1 %v757_v1, %s691_s20  ;;  %248 = vrot.lane.b32.xlu0 %v752_v0, %s691_s20 }
  0x5b   :  { %250 = vrot.lane.b32.xlu1 %v762_v2, %s691_s20  ;;  %246 = vrot.lane.b32.xlu0 %v764_v3, %s691_s20 }
  0x5f   :  { %291 = vrot.lane.b32.xlu1 %v757_v1, %s692_s21  ;;  %287 = vrot.lane.b32.xlu0 %v752_v0, %s692_s21 }
  0x63   :  { %289 = vrot.lane.b32.xlu1 %v762_v2, %s692_s21  ;;  %285 = vrot.lane.b32.xlu0 %v764_v3, %s692_s21 }
  0x67   :  { %330 = vrot.lane.b32.xlu1 %v757_v1, %s693_s22  ;;  %326 = vrot.lane.b32.xlu0 %v752_v0, %s693_s22 }
  0x6b   :  { %328 = vrot.lane.b32.xlu1 %v762_v2, %s693_s22  ;;  %324 = vrot.lane.b32.xlu0 %v764_v3, %s693_s22 }
  0x6f   :  { %369 = vrot.lane.b32.xlu1 %v757_v1, %s694_s23  ;;  %365 = vrot.lane.b32.xlu0 %v752_v0, %s694_s23  ;;  %v848_v0 = vmul.f32 %v221_v13, %v764_v3 }
  0x73   :  { %367 = vrot.lane.b32.xlu1 %v762_v2, %s694_s23  ;;  %363 = vrot.lane.b32.xlu0 %v764_v3, %s694_s23  ;;  %v866_v3 = vsub.s32 %v439_v49, %v441_v50 }
  0xa9   :  { %v106_v4 = vpop.permute.xlu1 %105  ;;  %v66_v5 = vpop.permute.xlu0 %65 }
  0xad   :  { %v110_v7 = vpop.permute.xlu1 %109  ;;  %v70_v8 = vpop.permute.xlu0 %69 }
  0xae   :  { %v113_v17 = vsel %vm111_vm0, %v106_v4, %v110_v7  ;;  %v115_v18 = vsel %vm111_vm0, %v110_v7, %v106_v4  ;;  %v75_v19 = vsel %vm73_vm1, %v66_v5, %v70_v8  ;;  %v77_v20 = vsel %vm73_vm1, %v70_v8, %v66_v5 }
  0xaf   :  { %v132_v32 = vmul.f32 %v115_v18, %v115_v18  ;;  %v133_v33 = vmul.f32 %v113_v17, %v113_v17  ;;  %v93_v36 = vmul.f32 %v77_v20, %v77_v20  ;;  %v94_v37 = vmul.f32 %v75_v19, %v75_v19 }
  0xb0   :  { %v124_v51 = vmul.f32 %v117_v23, %v115_v18  ;;  %v125_v52 = vmul.f32 %v118_v27, %v113_v17  ;;  %v85_v53 = vmul.f32 %v78_v34, %v77_v20  ;;  %v86_v54 = vmul.f32 %v79_v35, %v75_v19  ;;  %v156_v17 = vld [vmem:[#allocation6 + $0x20] sm:$0xff]  ;;  %v157_v18 = vld [vmem:[#allocation6 + $0x28] sm:$0xff] }
  0xb1   :  { %v68_v10 = vpop.permute.xlu1 %67  ;;  %v64_v11 = vpop.permute.xlu0 %63  ;;  %v136_v55 = vmul.f32 %v132_v32, %v825_v31  ;;  %v137_v56 = vmul.f32 %v133_v33, %v828_v38  ;;  %v97_v57 = vmul.f32 %v93_v36, %v81_v39  ;;  %v98_v58 = vmul.f32 %v94_v37, %v82_v40  ;;  %v159_v32 = vld [vmem:[#allocation6 + $0xb0] sm:$0xff]  ;;  %v160_v33 = vld [vmem:[#allocation6 + $0xb8] sm:$0xff] }
  0xb2   :  { %v74_v47 = vsel %vm73_vm1, %v64_v11, %v68_v10  ;;  %v76_v48 = vsel %vm73_vm1, %v68_v10, %v64_v11  ;;  %v861_v7 = vstv %s821_s24  ;;  %v864_v8 = vstv %s823_s25 }
  0xb3   :  { %v91_v59 = vmul.f32 %v76_v48, %v76_v48  ;;  %v92_v60 = vmul.f32 %v74_v47, %v74_v47  ;;  %v128_v10 = vadd.f32 %v124_v51, %v85_v53  ;;  %v129_v11 = vadd.f32 %v125_v52, %v86_v54 }
  0xb4   :  { %v140_v12 = vadd.f32 %v136_v55, %v97_v57  ;;  %v141_v13 = vadd.f32 %v137_v56, %v98_v58  ;;  %v83_v15 = vmul.f32 %v78_v34, %v76_v48  ;;  %v84_v24 = vmul.f32 %v79_v35, %v74_v47  ;;  %v198_v55 = vld [vmem:[#allocation6 + $0xc0] sm:$0xff]  ;;  %v199_v56 = vld [vmem:[#allocation6 + $0xc8] sm:$0xff] }
  0xb5   :  { %v108_v21 = vpop.permute.xlu1 %107  ;;  %v104_v22 = vpop.permute.xlu0 %103  ;;  %v95_v25 = vmul.f32 %v91_v59, %v81_v39  ;;  %v96_v26 = vmul.f32 %v92_v60, %v82_v40  ;;  %v195_v39 = vld [vmem:[#allocation6 + $0x30] sm:$0xff]  ;;  %v196_v40 = vld [vmem:[#allocation6 + $0x38] sm:$0xff] }
  0xb6   :  { %v112_v1 = vsel %vm111_vm0, %v104_v22, %v108_v21  ;;  %v114_v2 = vsel %vm111_vm0, %v108_v21, %v104_v22 }
  0xb7   :  { %v122_v14 = vmul.f32 %v117_v23, %v114_v2  ;;  %v123_v16 = vmul.f32 %v118_v27, %v112_v1 }
  0xb9   :  { %v149_v41 = vpop.permute.xlu1 %148  ;;  %v145_v42 = vpop.permute.xlu0 %144  ;;  %v126_v45 = vadd.f32 %v122_v14, %v83_v15  ;;  %v127_v46 = vadd.f32 %v123_v16, %v84_v24 }
  0xba   :  { %v152_v4 = vsel %vm150_vm2, %v145_v42, %v149_v41  ;;  %v154_v5 = vsel %vm150_vm2, %v149_v41, %v145_v42  ;;  %v130_v41 = vmul.f32 %v114_v2, %v114_v2  ;;  %v131_v42 = vmul.f32 %v112_v1, %v112_v1 }
  0xbb   :  { %v171_v19 = vmul.f32 %v154_v5, %v154_v5  ;;  %v172_v20 = vmul.f32 %v152_v4, %v152_v4  ;;  %v163_v34 = vmul.f32 %v156_v17, %v154_v5  ;;  %v164_v35 = vmul.f32 %v157_v18, %v152_v4 }
  0xbd   :  { %v147_v61 = vpop.permute.xlu1 %146  ;;  %v143_v62 = vpop.permute.xlu0 %142  ;;  %v175_v47 = vmul.f32 %v171_v19, %v159_v32  ;;  %v176_v48 = vmul.f32 %v172_v20, %v160_v33  ;;  %v167_v1 = vadd.f32 %v163_v34, %v128_v10  ;;  %v168_v2 = vadd.f32 %v164_v35, %v129_v11  ;;  %v260_v35 = vld [vmem:[#allocation6 + $0x50] sm:$0xff] }
  0xbe   :  { %v151_v36 = vsel %vm150_vm2, %v143_v62, %v147_v61  ;;  %v153_v23 = vsel %vm150_vm2, %v147_v61, %v143_v62  ;;  %v134_v61 = vmul.f32 %v130_v41, %v825_v31  ;;  %v135_v62 = vmul.f32 %v131_v42, %v828_v38 }
  0xbf   :  { %v169_v51 = vmul.f32 %v153_v23, %v153_v23  ;;  %v170_v52 = vmul.f32 %v151_v36, %v151_v36  ;;  %v179_v4 = vadd.f32 %v175_v47, %v140_v12  ;;  %v180_v5 = vadd.f32 %v176_v48, %v141_v13  ;;  %v261_v47 = vld [vmem:[#allocation6 + $0x58] sm:$0xff] }
  0xc0   :  { %v161_v14 = vmul.f32 %v156_v17, %v153_v23  ;;  %v162_v16 = vmul.f32 %v157_v18, %v151_v36  ;;  %v138_v12 = vadd.f32 %v134_v61, %v95_v25  ;;  %v139_v13 = vadd.f32 %v135_v62, %v96_v26 }
  0xc1   :  { %v188_v21 = vpop.permute.xlu1 %187  ;;  %v184_v22 = vpop.permute.xlu0 %183 }
  0xc2   :  { %v191_v27 = vsel %vm189_vm3, %v184_v22, %v188_v21  ;;  %v193_v37 = vsel %vm189_vm3, %v188_v21, %v184_v22  ;;  %v165_v17 = vadd.f32 %v161_v14, %v126_v45  ;;  %v166_v18 = vadd.f32 %v162_v16, %v127_v46  ;;  %v263_v45 = vld [vmem:[#allocation6 + $0xe0] sm:$0xff]  ;;  %v264_v46 = vld [vmem:[#allocation6 + $0xe8] sm:$0xff] }
  0xc3   :  { %v210_v53 = vmul.f32 %v193_v37, %v193_v37  ;;  %v211_v54 = vmul.f32 %v191_v27, %v191_v27  ;;  %v202_v57 = vmul.f32 %v195_v39, %v193_v37  ;;  %v203_v58 = vmul.f32 %v196_v40, %v191_v27 }
  0xc4   :  { %v173_v27 = vmul.f32 %v169_v51, %v159_v32  ;;  %v174_v37 = vmul.f32 %v170_v52, %v160_v33 }
  0xc5   :  { %v186_v49 = vpop.permute.xlu1 %185  ;;  %v182_v50 = vpop.permute.xlu0 %181  ;;  %v214_v21 = vmul.f32 %v210_v53, %v198_v55  ;;  %v215_v22 = vmul.f32 %v211_v54, %v199_v56  ;;  %v207_v31 = vadd.f32 %v203_v58, %v168_v2 }
  0xc6   :  { %v190_v59 = vsel %vm189_vm3, %v182_v50, %v186_v49  ;;  %v192_v60 = vsel %vm189_vm3, %v186_v49, %v182_v50  ;;  %v206_v49 = vadd.f32 %v202_v57, %v167_v1 }
  0xc7   :  { %v208_v15 = vmul.f32 %v192_v60, %v192_v60  ;;  %v209_v24 = vmul.f32 %v190_v59, %v190_v59  ;;  %v200_v41 = vmul.f32 %v195_v39, %v192_v60  ;;  %v201_v38 = vmul.f32 %v196_v40, %v190_v59 }
  0xc8   :  { %v218_v42 = vadd.f32 %v214_v21, %v179_v4  ;;  %v219_v34 = vadd.f32 %v215_v22, %v180_v5  ;;  %v177_v39 = vadd.f32 %v173_v27, %v138_v12  ;;  %v178_v40 = vadd.f32 %v174_v37, %v139_v13  ;;  %v299_v22 = vld [vmem:[#allocation6 + $0x60] sm:$0xff] }
  0xc9   :  { %v253_v19 = vpop.permute.xlu1 %252  ;;  %v249_v20 = vpop.permute.xlu0 %248  ;;  %v212_v32 = vmul.f32 %v208_v15, %v198_v55  ;;  %v213_v33 = vmul.f32 %v209_v24, %v199_v56  ;;  %v204_v51 = vadd.f32 %v200_v41, %v165_v17  ;;  %v205_v52 = vadd.f32 %v201_v38, %v166_v18 }
  0xca   :  { %v256_v10 = vsel %vm254_vm4, %v249_v20, %v253_v19  ;;  %v258_v11 = vsel %vm254_vm4, %v253_v19, %v249_v20  ;;  %v232_v25 = vadd.f32 %v814_v28, %v206_v49  ;;  %v233_v26 = vadd.f32 %v817_v29, %v207_v31 }
  0xcb   :  { %v275_v48 = vmul.f32 %v256_v10, %v256_v10  ;;  %v276_v50 = vmul.f32 %v258_v11, %v258_v11  ;;  %v267_v53 = vmul.f32 %v260_v35, %v256_v10  ;;  %v268_v54 = vmul.f32 %v261_v47, %v258_v11  ;;  %v302_v10 = vld [vmem:[#allocation6 + $0xf0] sm:$0xff]  ;;  %v303_v11 = vld [vmem:[#allocation6 + $0xf8] sm:$0xff] }
  0xcc   :  { %v216_v59 = vadd.f32 %v212_v32, %v177_v39  ;;  %v217_v60 = vadd.f32 %v213_v33, %v178_v40  ;;  %v244_v61 = vadd.f32 %v819_v30, %v218_v42  ;;  %v245_v28 = vadd.f32 %v830_v43, %v219_v34  ;;  %v300_v43 = vld [vmem:[#allocation6 + $0x68] sm:$0xff]  ;;  %v338_v39 = vld [vmem:[#allocation6 + $0x70] sm:$0xff] }
  0xcd   :  { %v251_v36 = vpop.permute.xlu1 %250  ;;  %v247_v23 = vpop.permute.xlu0 %246  ;;  %v279_v62 = vmul.f32 %v275_v48, %v263_v45  ;;  %v280_v29 = vmul.f32 %v276_v50, %v264_v46  ;;  %v231_v4 = vadd.f32 %v833_v44, %v205_v52  ;;  %v230_v5 = vadd.f32 %v848_v0, %v204_v51 }
  0xce   :  { %v255_v55 = vsel %vm254_vm4, %v247_v23, %v251_v36  ;;  %v257_v56 = vsel %vm254_vm4, %v251_v36, %v247_v23  ;;  %v271_v19 = vadd.f32 %v267_v53, %v232_v25  ;;  %v272_v20 = vadd.f32 %v268_v54, %v233_v26  ;;  %v341_v53 = vld [vmem:[#allocation6 + $0x100] sm:$0xff]  ;;  %v342_v54 = vld [vmem:[#allocation6 + $0x108] sm:$0xff] }
  0xcf   :  { %v273_v14 = vmul.f32 %v255_v55, %v255_v55  ;;  %v274_v16 = vmul.f32 %v257_v56, %v257_v56  ;;  %v265_v21 = vmul.f32 %v260_v35, %v255_v55  ;;  %v266_v30 = vmul.f32 %v261_v47, %v257_v56 }
  0xd0   :  { %v283_v31 = vadd.f32 %v279_v62, %v244_v61  ;;  %v284_v0 = vadd.f32 %v280_v29, %v245_v28  ;;  %v243_v41 = vadd.f32 %v845_v63, %v217_v60  ;;  %v242_v38 = vadd.f32 %v858_v6, %v216_v59  ;;  %v339_v63 = vld [vmem:[#allocation6 + $0x78] sm:$0xff] }
  0xd1   :  { %v292_v57 = vpop.permute.xlu1 %291  ;;  %v288_v58 = vpop.permute.xlu0 %287  ;;  %v277_v12 = vmul.f32 %v273_v14, %v263_v45  ;;  %v278_v13 = vmul.f32 %v274_v16, %v264_v46  ;;  %v269_v36 = vadd.f32 %v265_v21, %v230_v5  ;;  %v270_v23 = vadd.f32 %v266_v30, %v231_v4  ;;  %v377_v21 = vld [vmem:[#allocation6 + $0x80] sm:$0xff]  ;;  %v378_v30 = vld [vmem:[#allocation6 + $0x88] sm:$0xff] }
  0xd2   :  { %v295_v1 = vsel %vm293_vm5, %v288_v58, %v292_v57  ;;  %v297_v2 = vsel %vm293_vm5, %v292_v57, %v288_v58 }
  0xd3   :  { %v314_v27 = vmul.f32 %v295_v1, %v295_v1  ;;  %v315_v37 = vmul.f32 %v297_v2, %v297_v2  ;;  %v306_v17 = vmul.f32 %v299_v22, %v295_v1  ;;  %v307_v18 = vmul.f32 %v300_v43, %v297_v2 }
  0xd4   :  { %v281_v25 = vadd.f32 %v277_v12, %v242_v38  ;;  %v282_v26 = vadd.f32 %v278_v13, %v243_v41 }
  0xd5   :  { %v290_v15 = vpop.permute.xlu1 %289  ;;  %v286_v24 = vpop.permute.xlu0 %285  ;;  %v318_v35 = vmul.f32 %v314_v27, %v302_v10  ;;  %v319_v47 = vmul.f32 %v315_v37, %v303_v11  ;;  %v310_v45 = vadd.f32 %v306_v17, %v271_v19  ;;  %v311_v46 = vadd.f32 %v307_v18, %v272_v20 }
  0xd6   :  { %v294_v49 = vsel %vm293_vm5, %v286_v24, %v290_v15  ;;  %v296_v44 = vsel %vm293_vm5, %v290_v15, %v286_v24 }
  0xd7   :  { %v312_v42 = vmul.f32 %v294_v49, %v294_v49  ;;  %v313_v34 = vmul.f32 %v296_v44, %v296_v44  ;;  %v304_v48 = vmul.f32 %v299_v22, %v294_v49  ;;  %v305_v50 = vmul.f32 %v300_v43, %v296_v44 }
  0xd8   :  { %v322_v61 = vadd.f32 %v318_v35, %v283_v31  ;;  %v323_v28 = vadd.f32 %v319_v47, %v284_v0  ;;  %v380_v31 = vld [vmem:[#allocation6 + $0x110] sm:$0xff]  ;;  %v381_v0 = vld [vmem:[#allocation6 + $0x118] sm:$0xff] }
  0xd9   :  { %v331_v32 = vpop.permute.xlu1 %330  ;;  %v327_v33 = vpop.permute.xlu0 %326  ;;  %v316_v55 = vmul.f32 %v312_v42, %v302_v10  ;;  %v317_v56 = vmul.f32 %v313_v34, %v303_v11  ;;  %v308_v1 = vadd.f32 %v304_v48, %v269_v36  ;;  %v309_v2 = vadd.f32 %v305_v50, %v270_v23 }
  0xda   :  { %v334_v6 = vsel %vm332_vm6, %v327_v33, %v331_v32  ;;  %v336_v40 = vsel %vm332_vm6, %v331_v32, %v327_v33 }
  0xdb   :  { %v353_v51 = vmul.f32 %v334_v6, %v334_v6  ;;  %v354_v52 = vmul.f32 %v336_v40, %v336_v40  ;;  %v345_v57 = vmul.f32 %v338_v39, %v334_v6  ;;  %v346_v58 = vmul.f32 %v339_v63, %v336_v40 }
  0xdc   :  { %v320_v22 = vadd.f32 %v316_v55, %v281_v25  ;;  %v321_v43 = vadd.f32 %v317_v56, %v282_v26 }
  0xdd   :  { %v329_v59 = vpop.permute.xlu1 %328  ;;  %v325_v60 = vpop.permute.xlu0 %324  ;;  %v357_v4 = vmul.f32 %v353_v51, %v341_v53  ;;  %v358_v5 = vmul.f32 %v354_v52, %v342_v54  ;;  %v349_v15 = vadd.f32 %v345_v57, %v310_v45  ;;  %v350_v24 = vadd.f32 %v346_v58, %v311_v46 }
  0xde   :  { %v333_v62 = vsel %vm332_vm6, %v325_v60, %v329_v59  ;;  %v335_v29 = vsel %vm332_vm6, %v329_v59, %v325_v60 }
  0xdf   :  { %v343_v14 = vmul.f32 %v338_v39, %v333_v62  ;;  %v344_v16 = vmul.f32 %v339_v63, %v335_v29  ;;  %v351_v19 = vmul.f32 %v333_v62, %v333_v62  ;;  %v352_v20 = vmul.f32 %v335_v29, %v335_v29 }
  0xe0   :  { %v361_v17 = vadd.f32 %v357_v4, %v322_v61  ;;  %v362_v18 = vadd.f32 %v358_v5, %v323_v28 }
  0xe1   :  { %v370_v27 = vpop.permute.xlu1 %369  ;;  %v366_v37 = vpop.permute.xlu0 %365  ;;  %v355_v49 = vmul.f32 %v351_v19, %v341_v53  ;;  %v356_v44 = vmul.f32 %v352_v20, %v342_v54  ;;  %v347_v36 = vadd.f32 %v343_v14, %v308_v1  ;;  %v348_v23 = vadd.f32 %v344_v16, %v309_v2 }
  0xe2   :  { %v373_v41 = vsel %vm371_vm7, %v366_v37, %v370_v27  ;;  %v375_v38 = vsel %vm371_vm7, %v370_v27, %v366_v37 }
  0xe3   :  { %v384_v10 = vmul.f32 %v377_v21, %v373_v41  ;;  %v385_v11 = vmul.f32 %v378_v30, %v375_v38  ;;  %v392_v12 = vmul.f32 %v373_v41, %v373_v41  ;;  %v393_v13 = vmul.f32 %v375_v38, %v375_v38 }
  0xe4   :  { %v359_v39 = vadd.f32 %v355_v49, %v320_v22  ;;  %v360_v63 = vadd.f32 %v356_v44, %v321_v43 }
  0xe5   :  { %v388_v42 = vadd.f32 %v384_v10, %v349_v15  ;;  %v389_v34 = vadd.f32 %v385_v11, %v350_v24  ;;  %v396_v32 = vmul.f32 %v392_v12, %v380_v31  ;;  %v397_v33 = vmul.f32 %v393_v13, %v381_v0  ;;  %v368_v35 = vpop.permute.xlu1 %367  ;;  %v364_v47 = vpop.permute.xlu0 %363 }
  0xe6   :  { %v372_v6 = vsel %vm371_vm7, %v364_v47, %v368_v35  ;;  %v374_v40 = vsel %vm371_vm7, %v368_v35, %v364_v47 }
  0xe7   :  { %v400_v48 = vadd.f32 %v396_v32, %v361_v17  ;;  %v401_v50 = vadd.f32 %v397_v33, %v362_v18  ;;  %v414_v51 = vrot.slane %v388_v42, 4  ;;  %v420_v52 = vrot.slane %v389_v34, 4 }
  0xe8   :  { %v382_v25 = vmul.f32 %v377_v21, %v372_v6  ;;  %v383_v26 = vmul.f32 %v378_v30, %v374_v40  ;;  %v390_v45 = vmul.f32 %v372_v6, %v372_v6  ;;  %v391_v46 = vmul.f32 %v374_v40, %v374_v40 }
  0xe9   :  { %v415_v53 = vadd.f32 %v414_v51, %v388_v42  ;;  %v421_v54 = vadd.f32 %v420_v52, %v389_v34  ;;  %v479_v55 = vrot.slane %v400_v48, 4  ;;  %v485_v56 = vrot.slane %v401_v50, 4 }
  0xea   :  { %v386_v57 = vadd.f32 %v382_v25, %v347_v36  ;;  %v387_v58 = vadd.f32 %v383_v26, %v348_v23  ;;  %v394_v59 = vmul.f32 %v390_v45, %v380_v31  ;;  %v395_v60 = vmul.f32 %v391_v46, %v381_v0 }
  0xeb   :  { %v416_v61 = vrot.slane %v415_v53, 2  ;;  %v422_v28 = vrot.slane %v421_v54, 2  ;;  %v480_v9 = vadd.f32 %v479_v55, %v400_v48  ;;  %v486_v62 = vadd.f32 %v485_v56, %v401_v50 }
  0xec   :  { %v398_v29 = vadd.f32 %v394_v59, %v359_v39  ;;  %v399_v1 = vadd.f32 %v395_v60, %v360_v63  ;;  %v402_v2 = vrot.slane %v386_v57, 4  ;;  %v408_v4 = vrot.slane %v387_v58, 4 }
  0xed   :  { %v417_v5 = vadd.f32 %v416_v61, %v415_v53  ;;  %v423_v14 = vadd.f32 %v422_v28, %v421_v54  ;;  %v481_v16 = vrot.slane %v480_v9, 2  ;;  %v487_v19 = vrot.slane %v486_v62, 2 }
  0xee   :  { %v403_v20 = vadd.f32 %v402_v2, %v386_v57  ;;  %v409_v21 = vadd.f32 %v408_v4, %v387_v58  ;;  %v467_v30 = vrot.slane %v398_v29, 4  ;;  %v473_v22 = vrot.slane %v399_v1, 4 }
  0xef   :  { %v418_v43 = vrot.slane %v417_v5, 1  ;;  %v424_v15 = vrot.slane %v423_v14, 1  ;;  %v482_v24 = vadd.f32 %v481_v16, %v480_v9  ;;  %v488_v27 = vadd.f32 %v487_v19, %v486_v62 }
  0xf0   :  { %v404_v37 = vrot.slane %v403_v20, 2  ;;  %v410_v49 = vrot.slane %v409_v21, 2  ;;  %v468_v44 = vadd.f32 %v467_v30, %v398_v29  ;;  %v474_v31 = vadd.f32 %v473_v22, %v399_v1 }
  0xf1   :  { %v419_v0 = vadd.f32 %v418_v43, %v417_v5  ;;  %v425_v41 = vadd.f32 %v424_v15, %v423_v14  ;;  %v483_v38 = vrot.slane %v482_v24, 1  ;;  %v489_v10 = vrot.slane %v488_v27, 1 }
  0xf2   :  { %v405_v11 = vadd.f32 %v404_v37, %v403_v20  ;;  %v411_v12 = vadd.f32 %v410_v49, %v409_v21  ;;  %v469_v13 = vrot.slane %v468_v44, 2  ;;  %v475_v17 = vrot.slane %v474_v31, 2 }
  0xf3   :  { %v430_v18 = vadd.f32 %v861_v7, %v419_v0  ;;  %v431_v36 = vadd.f32 %v861_v7, %v425_v41  ;;  %v484_v23 = vadd.f32 %v483_v38, %v482_v24  ;;  %v490_v42 = vadd.f32 %v489_v10, %v488_v27 }
  0xf4   :  { %v406_v34 = vrot.slane %v405_v11, 1  ;;  %v412_v32 = vrot.slane %v411_v12, 1  ;;  %v470_v33 = vadd.f32 %v469_v13, %v468_v44  ;;  %v476_v35 = vadd.f32 %v475_v17, %v474_v31 }
  0xf5   :  { %v444_v47 = vcombine.low %v430_v18, %v431_v36  ;;  %v495_v39 = vadd.f32 %v864_v8, %v484_v23  ;;  %v496_v63 = vadd.f32 %v864_v8, %v490_v42 }
  0xf6   :  { %v407_v6 = vadd.f32 %v406_v34, %v405_v11  ;;  %v413_v40 = vadd.f32 %v412_v32, %v411_v12  ;;  %v471_v48 = vrot.slane %v470_v33, 1  ;;  %v477_v50 = vrot.slane %v476_v35, 1 }
  0xf7   :  { %v451_v51 = vrot.slane %v444_v47, %v866_v3  ;;  %v509_v52 = vcombine.low %v495_v39, %v496_v63 }
  0xf8   :  { %v428_v25 = vadd.f32 %v861_v7, %v407_v6  ;;  %v429_v26 = vadd.f32 %v861_v7, %v413_v40  ;;  %v472_v45 = vadd.f32 %v471_v48, %v470_v33  ;;  %v478_v46 = vadd.f32 %v477_v50, %v476_v35 }
  0xf9   :  { %v516_v56 = vrot.slane %v509_v52, %v866_v3  ;;  %v456_v58 = vrot.slane %v451_v51, 7 }
  0xfa   :  { %v493_v53 = vadd.f32 %v864_v8, %v472_v45  ;;  %v494_v54 = vadd.f32 %v864_v8, %v478_v46  ;;  %v436_v55 = vcombine.low %v428_v25, %v429_v26 }
  0xfb   :  { %v519_v61 = vrot.slane %v516_v56, 7 }
  0xfc   :  { %v443_v57 = vrot.slane %v436_v55, %v866_v3  ;;  %v501_v59 = vcombine.low %v493_v53, %v494_v54 }
  0xfe   :  { %v458_v7 = vsel %vm457_vm8, %v456_v58, %v443_v57  ;;  %v508_v60 = vrot.slane %v501_v59, %v866_v3 }
  0xff   :  { %v460_v8 = vsel %vm459_vm9, %v456_v58, %v458_v7 }
 0x100   :  { %v462_v28 = vsel %vm461_vm10, %v456_v58, %v460_v8  ;;  %v520_v9 = vsel %vm457_vm8, %v519_v61, %v508_v60 }
 0x101   :  { %v464_v62 = vsel %vm463_vm11, %v456_v58, %v462_v28  ;;  %v521_v29 = vsel %vm459_vm9, %v519_v61, %v520_v9 }
 0x102   :  { %466 = vst [vmem:[#allocation9] sm:$0xf] %v464_v62  ;;  %v522_v1 = vsel %vm461_vm10, %v519_v61, %v521_v29 }
 0x103   :  { %640 = shalt.err (!%p637_p11)
}
 0x104   :  { %s641_s7 = scalar_lea.hbm %s973_s3, 64 }
 0x105   :  { %p642_p12 = scmp.ne.s32.totalorder %s973_s3, %s641_s7  ;;  %p645_p13 = scmp.lt.u32.totalorder %s641_s7, %s973_s3 }
 0x107   :  { %p647_p0 = pnand %p645_p13, %p642_p12 }
 0x109   :  { %650 = shalt.err (!%p647_p0)
}
 0x10a   :  { %535 = dma.vmem_to_hbm [thread:$0]  %s533_s27, 64, %s973_s3, [#allocation4]   ;;  %v523_v3 = vsel %vm463_vm11, %v519_v61, %v522_v1 }
 0x10b   :  { %525 = vst [vmem:[#allocation10] sm:$0xf] %v523_v3  ;;  %s651_s14 = scalar_lea.vmem %s543_s29, 64  ;;  %p656_p2 = scmp.lt.s32.totalorder %s543_s29, %s543_s29 }
 0x10c   :  { %p652_p1 = scmp.ne.s32.totalorder %s543_s29, %s651_s14  ;;  %p657_p3 = scmp.lt.s32.totalorder %s651_s14, %s651_s14 }
 0x10e   :  { %p658_p4 = por %p657_p3, %p656_p2 }
 0x110   :  { %p659_p5 = pnand %p658_p4, %p652_p1 }
 0x112   :  { %662 = shalt.err (!%p659_p5)
}
 0x113   :  { %s663_s15 = scalar_lea.hbm %s974_s4, 64 }
 0x114   :  { %p664_p6 = scmp.ne.s32.totalorder %s974_s4, %s663_s15  ;;  %p667_p7 = scmp.lt.u32.totalorder %s663_s15, %s974_s4 }
 0x116   :  { %p669_p8 = pnand %p667_p7, %p664_p6 }
 0x118   :  { %672 = shalt.err (!%p669_p8)
}
 0x119   :  { %545 = dma.vmem_to_hbm [thread:$0]  %s543_s29, 64, %s974_s4, [#allocation11]  }
 0x11a   :  { %679 = dma.done.wait [#allocation4], 64  }
 0x11b   :  { %680 = vsyncadd [#allocation4], 4294967232 }
 0x11c   :  { %681 = dma.done.wait [#allocation11], 64  }
 0x11d   :  { %682 = vsyncadd [#allocation11], 4294967232 }
 0x11e   :  { %552 = vsyncpa [#allocation3], 1 }
 0x11f   :  { %553 = vsyncpa [#allocation7], 1 }
 0x120   :  { %554 = vsyncpa [#allocation4], 1 }
 0x121   :  { %555 = vsyncpa [#allocation11], 1 }
 0x122   :  { %556 = vsyncpa [#allocation5], 1 }

</bundles_post_ra>
